<compile_context>
chip_gen: v5e
topology: v5e:2x2
jax: 0.10.0
libtpu: 0.0.40
codegen_flags: <defaults>
</compile_context>

<pallas_src>
import math
from functools import partial

import jax
import jax.numpy as jnp
from jax.experimental import pallas as pl
from jax.experimental.pallas import tpu as pltpu


# ----------------------------------------------------------------------------
# Pallas kernel: one full transformer block for a single batch element
# ----------------------------------------------------------------------------
def _block_kernel(x_ref, kmask_ref,
                  qkv_w_ref, qkv_b_ref,
                  out_w_ref, out_b_ref,
                  ln2_g_ref, ln2_b_ref,
                  fc1_w_ref, fc1_b_ref,
                  fc2_w_ref, fc2_b_ref,
                  o_ref, *, num_heads, head_dim):
    H = num_heads * head_dim

    x = x_ref[...]                                   # (S, H) f32
    x_b = x.astype(jnp.bfloat16)

    # --- QKV projection: bf16 operands, f32 accumulation on the MXU ---
    qkv = jnp.dot(x_b, qkv_w_ref[...],
                  preferred_element_type=jnp.float32) + qkv_b_ref[...]   # (S, 3H) f32

    scale = 1.0 / math.sqrt(head_dim)
    q = qkv[:, 0:H] * scale                          # fold 1/sqrt(d) into q (cheaper than on scores)
    k = qkv[:, H:2 * H]
    v = qkv[:, 2 * H:3 * H]

    # --- head-major stacks (num_heads, S, head_dim): one relayout, then
    #     batched contractions keep the MXU busy instead of per-head matmuls ---
    def split_heads(t):
        return jnp.stack(
            [t[:, h * head_dim:(h + 1) * head_dim] for h in range(num_heads)],
            axis=0)

    qh = split_heads(q).astype(jnp.bfloat16)
    kh = split_heads(k).astype(jnp.bfloat16)
    vh = split_heads(v).astype(jnp.bfloat16)

    # --- mask hoisted out of the attention math: additive key bias, f32 ---
    neg_bias = jnp.where(kmask_ref[...] == 0.0, -1e9, 0.0)   # (1, S)

    # --- scaled dot-product attention, batched over heads ---
    scores = jnp.einsum('hqd,hkd->hqk', qh, kh,
                        preferred_element_type=jnp.float32)  # (nh, S, S) f32
    scores = scores + neg_bias[None, :, :]
    scores = scores - jnp.max(scores, axis=-1, keepdims=True)   # stable softmax
    p = jnp.exp(scores)
    p = p * pl.reciprocal(jnp.sum(p, axis=-1, keepdims=True), approx=True)

    ctx = jnp.einsum('hqk,hkd->hqd', p.astype(jnp.bfloat16), vh,
                     preferred_element_type=jnp.float32)     # (nh, S, dh)

    # --- output projection folded per head (out_w_ref is (nh, dh, H)); the
    #     reduction over the head axis replaces the lane-wise concatenate ---
    proj = jnp.einsum('hqd,hde->hqe', ctx.astype(jnp.bfloat16), out_w_ref[...],
                      preferred_element_type=jnp.float32)    # (nh, S, H)
    attn = jnp.sum(proj, axis=0) + out_b_ref[...]            # (S, H) f32

    # --- first residual (norm1 is unused in the reference module) ---
    x1 = x + attn

    # --- LayerNorm (norm2), eps = 1e-5, stats in f32, rsqrt on the EUP ---
    mu = jnp.mean(x1, axis=-1, keepdims=True)
    var = jnp.mean((x1 - mu) ** 2, axis=-1, keepdims=True)
    xn = (x1 - mu) * jax.lax.rsqrt(var + 1e-5)
    xn = xn * ln2_g_ref[...] + ln2_b_ref[...]

    # --- FeedForward with NewGELU (tanh -> EUP; cube as two VPU multiplies) ---
    h1 = jnp.dot(xn.astype(jnp.bfloat16), fc1_w_ref[...],
                 preferred_element_type=jnp.float32) + fc1_b_ref[...]
    g = 0.5 * h1 * (1.0 + jnp.tanh(math.sqrt(2.0 / math.pi)
                                   * (h1 + 0.044715 * (h1 * h1 * h1))))
    h2 = jnp.dot(g.astype(jnp.bfloat16), fc2_w_ref[...],
                 preferred_element_type=jnp.float32) + fc2_b_ref[...]

    # --- second residual ---
    o_ref[...] = x1 + h2


def transformer_block(x, kmask, p, num_heads):
    """x: (B, S, H) f32, kmask: (B, 1, S) f32 (1=attend, 0=masked) -> (B, S, H)."""
    B, S, H = x.shape
    dh = H // num_heads
    F = p["fc1_w"].shape[1]

    # Ship weights in bf16 (halves HBM->VMEM DMA and VMEM residency); the
    # output projection is pre-reshaped head-major so the kernel needs no
    # lane-splitting reshape.
    qkv_w = p["qkv_w"].astype(jnp.bfloat16)
    out_w3 = p["out_w"].reshape(num_heads, dh, H).astype(jnp.bfloat16)
    fc1_w = p["fc1_w"].astype(jnp.bfloat16)
    fc2_w = p["fc2_w"].astype(jnp.bfloat16)

    def const2d(shape):
        return pl.BlockSpec(shape, lambda b: (0, 0))

    kernel = partial(_block_kernel, num_heads=num_heads, head_dim=dh)
    return pl.pallas_call(
        kernel,
        out_shape=jax.ShapeDtypeStruct((B, S, H), jnp.float32),
        grid=(B,),
        in_specs=[
            pl.BlockSpec((None, S, H), lambda b: (b, 0, 0)),          # x (per-batch slice)
            pl.BlockSpec((None, 1, S), lambda b: (b, 0, 0)),          # compact key mask
            const2d((H, 3 * H)), const2d((1, 3 * H)),                 # qkv proj (bf16 W)
            pl.BlockSpec((num_heads, dh, H), lambda b: (0, 0, 0)),    # out proj, head-major (bf16)
            const2d((1, H)),                                          # out bias
            const2d((1, H)), const2d((1, H)),                         # layernorm2 gamma/beta
            const2d((H, F)), const2d((1, F)),                         # fc1 (bf16 W)
            const2d((F, H)), const2d((1, H)),                         # fc2 (bf16 W)
        ],
        out_specs=pl.BlockSpec((None, S, H), lambda b: (b, 0, 0)),
        compiler_params=pltpu.CompilerParams(
            dimension_semantics=("parallel",),
            vmem_limit_bytes=64 * 1024 * 1024),
    )(x, kmask,
      qkv_w, p["qkv_b"],
      out_w3, p["out_b"],
      p["ln2_g"], p["ln2_b"],
      fc1_w, p["fc1_b"],
      fc2_w, p["fc2_b"])


# ----------------------------------------------------------------------------
# Encoder wrapper + deterministic synthetic parameters
# ----------------------------------------------------------------------------
def encoder_forward(x, key_mask, params, num_heads):
    """x: (B, S, H) f32; key_mask: (B, S) with 1=attend / 0=masked (or None)."""
    B, S, H = x.shape
    if key_mask is None:
        kmask = jnp.ones((B, 1, S), jnp.float32)
    else:
        kmask = key_mask.astype(jnp.float32).reshape(B, 1, S)
    for blk in params["blocks"]:
        x = transformer_block(x, kmask, blk, num_heads)
    return x


def init_params(key, hidden_size, ff_dim, num_blocks):
    H, F = hidden_size, ff_dim
    keys = jax.random.split(key, num_blocks)
    blocks = []
    for b in range(num_blocks):
        ks = jax.random.split(keys[b], 8)
        blocks.append({
            # nn.Linear weights stored transposed: (in_features, out_features)
            "qkv_w": jax.random.normal(ks[0], (H, 3 * H), jnp.float32) * 0.02,
            "qkv_b": jax.random.normal(ks[1], (1, 3 * H), jnp.float32) * 0.02,
            "out_w": jax.random.normal(ks[2], (H, H), jnp.float32) * 0.02,
            "out_b": jax.random.normal(ks[3], (1, H), jnp.float32) * 0.02,
            "ln2_g": jnp.ones((1, H), jnp.float32),
            "ln2_b": jnp.zeros((1, H), jnp.float32),
            "fc1_w": jax.random.normal(ks[4], (H, F), jnp.float32) * 0.02,
            "fc1_b": jax.random.normal(ks[5], (1, F), jnp.float32) * 0.02,
            "fc2_w": jax.random.normal(ks[6], (F, H), jnp.float32) * 0.02,
            "fc2_b": jax.random.normal(ks[7], (1, H), jnp.float32) * 0.02,
        })
    return {"blocks": blocks}


# ----------------------------------------------------------------------------
# Pure-JAX f32 reference (mirrors the PyTorch Encoder forward)
# ----------------------------------------------------------------------------
def _ref_block(x, mask3, p, num_heads):
    B, S, H = x.shape
    dh = H // num_heads
    qkv = x @ p["qkv_w"] + p["qkv_b"][0]
    q, k, v = jnp.split(qkv, 3, axis=-1)

    def to_heads(t):
        return t.reshape(B, S, num_heads, dh).transpose(0, 2, 1, 3)

    q, k, v = to_heads(q), to_heads(k), to_heads(v)
    sc = jnp.einsum("bhqd,bhkd->bhqk", q, k) / math.sqrt(dh)
    sc = jnp.where(mask3[:, None, :, :] == 0, -1e9, sc)
    pr = jax.nn.softmax(sc, axis=-1)
    ao = jnp.einsum("bhqk,bhkd->bhqd", pr, v).transpose(0, 2, 1, 3).reshape(B, S, H)
    ao = ao @ p["out_w"] + p["out_b"][0]
    x1 = x + ao
    mu = x1.mean(-1, keepdims=True)
    var = ((x1 - mu) ** 2).mean(-1, keepdims=True)
    xn = (x1 - mu) / jnp.sqrt(var + 1e-5) * p["ln2_g"][0] + p["ln2_b"][0]
    h1 = xn @ p["fc1_w"] + p["fc1_b"][0]
    g = 0.5 * h1 * (1.0 + jnp.tanh(math.sqrt(2.0 / math.pi) * (h1 + 0.044715 * h1 ** 3)))
    return x1 + (g @ p["fc2_w"] + p["fc2_b"][0])


def _ref_forward(x, key_mask, params, num_heads):
    B, S, H = x.shape
    mask3 = jnp.broadcast_to(key_mask.astype(jnp.float32)[:, None, :], (B, S, S))
    for blk in params["blocks"]:
        x = _ref_block(x, mask3, blk, num_heads)
    return x


# ----------------------------------------------------------------------------
if __name__ == "__main__":
    HIDDEN, NUM_HEADS, FF_DIM, NUM_BLOCKS = 32, 4, 64, 2
    B, S = 2, 8

    key = jax.random.PRNGKey(0)
    kx, kp = jax.random.split(key)
    params = init_params(kp, HIDDEN, FF_DIM, NUM_BLOCKS)

    x = jax.random.normal(kx, (B, S, HIDDEN), jnp.float32)
    key_mask = jnp.ones((B, S), jnp.float32).at[0, -1].set(0.0)  # exercise masking

    fwd = jax.jit(partial(encoder_forward, num_heads=NUM_HEADS))
    out = jax.block_until_ready(fwd(x, key_mask, params))
    assert out.shape == (B, S, HIDDEN) and out.dtype == jnp.float32

    ref = jax.block_until_ready(_ref_forward(x, key_mask, params, NUM_HEADS))
    err = float(jnp.max(jnp.abs(out - ref)))
    # bf16 matmuls with f32 accumulation: allow a small precision delta vs f32 ref.
    assert err < 2e-2, f"mismatch vs JAX reference, max abs err = {err}"

    print("KERNEL_OK")
</pallas_src>

<mosaic_0001>
module attributes {stable_mosaic.version = 11 : i64} {
  func.func @_block_kernel(%arg0: i32, %arg1: memref<1x8x32xf32, #tpu.memory_space<vmem>>, %arg2: memref<1x1x8xf32, #tpu.memory_space<vmem>>, %arg3: memref<32x96xbf16, #tpu.memory_space<vmem>>, %arg4: memref<1x96xf32, #tpu.memory_space<vmem>>, %arg5: memref<4x8x32xbf16, #tpu.memory_space<vmem>>, %arg6: memref<1x32xf32, #tpu.memory_space<vmem>>, %arg7: memref<1x32xf32, #tpu.memory_space<vmem>>, %arg8: memref<1x32xf32, #tpu.memory_space<vmem>>, %arg9: memref<32x64xbf16, #tpu.memory_space<vmem>>, %arg10: memref<1x64xf32, #tpu.memory_space<vmem>>, %arg11: memref<64x32xbf16, #tpu.memory_space<vmem>>, %arg12: memref<1x32xf32, #tpu.memory_space<vmem>>, %arg13: memref<1x8x32xf32, #tpu.memory_space<vmem>>) attributes {dimension_semantics = [#tpu.dimension_semantics<parallel>], iteration_bounds = array<i64: 2>, scalar_prefetch = 0 : i64, scratch_operands = 0 : i64, tpu.core_type = #tpu.core_type<tc>, window_params = [{transform_indices = @transform_0, window_bounds = array<i64: 1, 8, 32>}, {transform_indices = @transform_1, window_bounds = array<i64: 1, 1, 8>}, {pipeline_mode = #tpu.pipeline_mode<synchronous>, transform_indices = @transform_2, window_bounds = array<i64: 32, 96>}, {pipeline_mode = #tpu.pipeline_mode<synchronous>, transform_indices = @transform_3, window_bounds = array<i64: 1, 96>}, {pipeline_mode = #tpu.pipeline_mode<synchronous>, transform_indices = @transform_4, window_bounds = array<i64: 4, 8, 32>}, {pipeline_mode = #tpu.pipeline_mode<synchronous>, transform_indices = @transform_5, window_bounds = array<i64: 1, 32>}, {pipeline_mode = #tpu.pipeline_mode<synchronous>, transform_indices = @transform_6, window_bounds = array<i64: 1, 32>}, {pipeline_mode = #tpu.pipeline_mode<synchronous>, transform_indices = @transform_7, window_bounds = array<i64: 1, 32>}, {pipeline_mode = #tpu.pipeline_mode<synchronous>, transform_indices = @transform_8, window_bounds = array<i64: 32, 64>}, {pipeline_mode = #tpu.pipeline_mode<synchronous>, transform_indices = @transform_9, window_bounds = array<i64: 1, 64>}, {pipeline_mode = #tpu.pipeline_mode<synchronous>, transform_indices = @transform_10, window_bounds = array<i64: 64, 32>}, {pipeline_mode = #tpu.pipeline_mode<synchronous>, transform_indices = @transform_11, window_bounds = array<i64: 1, 32>}, {transform_indices = @transform_12, window_bounds = array<i64: 1, 8, 32>}]} {
    %c0 = arith.constant 0 : index
    %c0_0 = arith.constant 0 : index
    %c0_1 = arith.constant 0 : index
    %0 = vector.load %arg1[%c0, %c0_0, %c0_1] : memref<1x8x32xf32, #tpu.memory_space<vmem>>, vector<1x8x32xf32>
    %1 = vector.shape_cast %0 : vector<1x8x32xf32> to vector<8x32xf32>
    %2 = arith.truncf %1 : vector<8x32xf32> to vector<8x32xbf16>
    %c0_2 = arith.constant 0 : index
    %c0_3 = arith.constant 0 : index
    %3 = vector.load %arg3[%c0_2, %c0_3] : memref<32x96xbf16, #tpu.memory_space<vmem>>, vector<32x96xbf16>
    %cst = arith.constant dense<0.000000e+00> : vector<8x96xf32>
    %4 = tpu.matmul %2, %3, %cst {dimension_numbers = #tpu.dot_dimension_numbers<[1], [0], [0], [1], [0, 0, 1, 1], [], []>} : vector<8x32xbf16>, vector<32x96xbf16>, vector<8x96xf32> -> vector<8x96xf32>
    %c0_4 = arith.constant 0 : index
    %c0_5 = arith.constant 0 : index
    %5 = vector.load %arg4[%c0_4, %c0_5] : memref<1x96xf32, #tpu.memory_space<vmem>>, vector<1x96xf32>
    %6 = vector.broadcast %5 : vector<1x96xf32> to vector<8x96xf32>
    %7 = arith.addf %4, %6 : vector<8x96xf32>
    %8 = vector.extract_strided_slice %7 {offsets = [0, 0], sizes = [8, 32], strides = [1, 1]} : vector<8x96xf32> to vector<8x32xf32>
    %cst_6 = arith.constant 0.353553385 : f32
    %9 = vector.broadcast %cst_6 : f32 to vector<8x32xf32>
    %10 = arith.mulf %8, %9 : vector<8x32xf32>
    %11 = vector.extract_strided_slice %7 {offsets = [0, 32], sizes = [8, 32], strides = [1, 1]} : vector<8x96xf32> to vector<8x32xf32>
    %12 = vector.extract_strided_slice %7 {offsets = [0, 64], sizes = [8, 32], strides = [1, 1]} : vector<8x96xf32> to vector<8x32xf32>
    %13 = vector.extract_strided_slice %10 {offsets = [0, 0], sizes = [8, 8], strides = [1, 1]} : vector<8x32xf32> to vector<8x8xf32>
    %14 = vector.extract_strided_slice %10 {offsets = [0, 8], sizes = [8, 8], strides = [1, 1]} : vector<8x32xf32> to vector<8x8xf32>
    %15 = vector.extract_strided_slice %10 {offsets = [0, 16], sizes = [8, 8], strides = [1, 1]} : vector<8x32xf32> to vector<8x8xf32>
    %16 = vector.extract_strided_slice %10 {offsets = [0, 24], sizes = [8, 8], strides = [1, 1]} : vector<8x32xf32> to vector<8x8xf32>
    %17 = vector.shape_cast %13 : vector<8x8xf32> to vector<1x8x8xf32>
    %18 = vector.shape_cast %14 : vector<8x8xf32> to vector<1x8x8xf32>
    %19 = vector.shape_cast %15 : vector<8x8xf32> to vector<1x8x8xf32>
    %20 = vector.shape_cast %16 : vector<8x8xf32> to vector<1x8x8xf32>
    %21 = tpu.concatenate %17, %18, %19, %20 in 0 : vector<1x8x8xf32>, vector<1x8x8xf32>, vector<1x8x8xf32>, vector<1x8x8xf32> -> vector<4x8x8xf32>
    %22 = arith.truncf %21 : vector<4x8x8xf32> to vector<4x8x8xbf16>
    %23 = vector.extract_strided_slice %11 {offsets = [0, 0], sizes = [8, 8], strides = [1, 1]} : vector<8x32xf32> to vector<8x8xf32>
    %24 = vector.extract_strided_slice %11 {offsets = [0, 8], sizes = [8, 8], strides = [1, 1]} : vector<8x32xf32> to vector<8x8xf32>
    %25 = vector.extract_strided_slice %11 {offsets = [0, 16], sizes = [8, 8], strides = [1, 1]} : vector<8x32xf32> to vector<8x8xf32>
    %26 = vector.extract_strided_slice %11 {offsets = [0, 24], sizes = [8, 8], strides = [1, 1]} : vector<8x32xf32> to vector<8x8xf32>
    %27 = vector.shape_cast %23 : vector<8x8xf32> to vector<1x8x8xf32>
    %28 = vector.shape_cast %24 : vector<8x8xf32> to vector<1x8x8xf32>
    %29 = vector.shape_cast %25 : vector<8x8xf32> to vector<1x8x8xf32>
    %30 = vector.shape_cast %26 : vector<8x8xf32> to vector<1x8x8xf32>
    %31 = tpu.concatenate %27, %28, %29, %30 in 0 : vector<1x8x8xf32>, vector<1x8x8xf32>, vector<1x8x8xf32>, vector<1x8x8xf32> -> vector<4x8x8xf32>
    %32 = arith.truncf %31 : vector<4x8x8xf32> to vector<4x8x8xbf16>
    %33 = vector.extract_strided_slice %12 {offsets = [0, 0], sizes = [8, 8], strides = [1, 1]} : vector<8x32xf32> to vector<8x8xf32>
    %34 = vector.extract_strided_slice %12 {offsets = [0, 8], sizes = [8, 8], strides = [1, 1]} : vector<8x32xf32> to vector<8x8xf32>
    %35 = vector.extract_strided_slice %12 {offsets = [0, 16], sizes = [8, 8], strides = [1, 1]} : vector<8x32xf32> to vector<8x8xf32>
    %36 = vector.extract_strided_slice %12 {offsets = [0, 24], sizes = [8, 8], strides = [1, 1]} : vector<8x32xf32> to vector<8x8xf32>
    %37 = vector.shape_cast %33 : vector<8x8xf32> to vector<1x8x8xf32>
    %38 = vector.shape_cast %34 : vector<8x8xf32> to vector<1x8x8xf32>
    %39 = vector.shape_cast %35 : vector<8x8xf32> to vector<1x8x8xf32>
    %40 = vector.shape_cast %36 : vector<8x8xf32> to vector<1x8x8xf32>
    %41 = tpu.concatenate %37, %38, %39, %40 in 0 : vector<1x8x8xf32>, vector<1x8x8xf32>, vector<1x8x8xf32>, vector<1x8x8xf32> -> vector<4x8x8xf32>
    %42 = arith.truncf %41 : vector<4x8x8xf32> to vector<4x8x8xbf16>
    %c0_7 = arith.constant 0 : index
    %c0_8 = arith.constant 0 : index
    %c0_9 = arith.constant 0 : index
    %43 = vector.load %arg2[%c0_7, %c0_8, %c0_9] : memref<1x1x8xf32, #tpu.memory_space<vmem>>, vector<1x1x8xf32>
    %44 = vector.shape_cast %43 : vector<1x1x8xf32> to vector<1x8xf32>
    %cst_10 = arith.constant 0.000000e+00 : f32
    %45 = vector.broadcast %cst_10 : f32 to vector<1x8xf32>
    %46 = arith.cmpf oeq, %44, %45 : vector<1x8xf32>
    %cst_11 = arith.constant -1.000000e+09 : f32
    %cst_12 = arith.constant 0.000000e+00 : f32
    %47 = vector.broadcast %cst_11 : f32 to vector<1x8xf32>
    %48 = vector.broadcast %cst_12 : f32 to vector<1x8xf32>
    %49 = arith.select %46, %47, %48 : vector<1x8xi1>, vector<1x8xf32>
    "tpu.trace_start"() <{level = 10 : i32, message = "hqd,hkd->hqk"}> : () -> ()
    %cst_13 = arith.constant dense<0.000000e+00> : vector<4x8x8xf32>
    %50 = tpu.matmul %22, %32, %cst_13 {dimension_numbers = #tpu.dot_dimension_numbers<[2], [2], [1], [1], [0, 0, 0, 1, 1, 1], [0], [0]>} : vector<4x8x8xbf16>, vector<4x8x8xbf16>, vector<4x8x8xf32> -> vector<4x8x8xf32>
    "tpu.trace_stop"() : () -> ()
    %51 = vector.shape_cast %49 : vector<1x8xf32> to vector<1x1x8xf32>
    %52 = vector.broadcast %51 : vector<1x1x8xf32> to vector<4x8x8xf32>
    %53 = arith.addf %50, %52 : vector<4x8x8xf32>
    %cst_14 = arith.constant dense<0xFF800000> : vector<4x8xf32>
    %54 = vector.multi_reduction <maximumf>, %53, %cst_14 [2] : vector<4x8x8xf32> to vector<4x8xf32>
    %55 = vector.shape_cast %54 : vector<4x8xf32> to vector<4x8x1xf32>
    %56 = vector.broadcast %55 : vector<4x8x1xf32> to vector<4x8x8xf32>
    %57 = arith.subf %53, %56 : vector<4x8x8xf32>
    %58 = math.exp %57 : vector<4x8x8xf32>
    %cst_15 = arith.constant dense<0.000000e+00> : vector<4x8xf32>
    %59 = vector.multi_reduction <add>, %58, %cst_15 [2] : vector<4x8x8xf32> to vector<4x8xf32>
    %60 = vector.shape_cast %59 : vector<4x8xf32> to vector<4x8x1xf32>
    %61 = tpu.reciprocal %60 {approx = true} : vector<4x8x1xf32> -> vector<4x8x1xf32>
    %62 = vector.broadcast %61 : vector<4x8x1xf32> to vector<4x8x8xf32>
    %63 = arith.mulf %58, %62 : vector<4x8x8xf32>
    %64 = arith.truncf %63 : vector<4x8x8xf32> to vector<4x8x8xbf16>
    "tpu.trace_start"() <{level = 10 : i32, message = "hqk,hkd->hqd"}> : () -> ()
    %cst_16 = arith.constant dense<0.000000e+00> : vector<4x8x8xf32>
    %65 = tpu.matmul %64, %42, %cst_16 {dimension_numbers = #tpu.dot_dimension_numbers<[2], [1], [1], [2], [0, 0, 0, 1, 1, 2], [0], [0]>} : vector<4x8x8xbf16>, vector<4x8x8xbf16>, vector<4x8x8xf32> -> vector<4x8x8xf32>
    "tpu.trace_stop"() : () -> ()
    %66 = arith.truncf %65 : vector<4x8x8xf32> to vector<4x8x8xbf16>
    %c0_17 = arith.constant 0 : index
    %c0_18 = arith.constant 0 : index
    %c0_19 = arith.constant 0 : index
    %67 = vector.load %arg5[%c0_17, %c0_18, %c0_19] : memref<4x8x32xbf16, #tpu.memory_space<vmem>>, vector<4x8x32xbf16>
    "tpu.trace_start"() <{level = 10 : i32, message = "hqd,hde->hqe"}> : () -> ()
    %cst_20 = arith.constant dense<0.000000e+00> : vector<4x8x32xf32>
    %68 = tpu.matmul %66, %67, %cst_20 {dimension_numbers = #tpu.dot_dimension_numbers<[2], [1], [1], [2], [0, 0, 0, 1, 1, 2], [0], [0]>} : vector<4x8x8xbf16>, vector<4x8x32xbf16>, vector<4x8x32xf32> -> vector<4x8x32xf32>
    "tpu.trace_stop"() : () -> ()
    %cst_21 = arith.constant dense<0.000000e+00> : vector<8x32xf32>
    %69 = vector.multi_reduction <add>, %68, %cst_21 [0] : vector<4x8x32xf32> to vector<8x32xf32>
    %c0_22 = arith.constant 0 : index
    %c0_23 = arith.constant 0 : index
    %70 = vector.load %arg6[%c0_22, %c0_23] : memref<1x32xf32, #tpu.memory_space<vmem>>, vector<1x32xf32>
    %71 = vector.broadcast %70 : vector<1x32xf32> to vector<8x32xf32>
    %72 = arith.addf %69, %71 : vector<8x32xf32>
    %73 = arith.addf %1, %72 : vector<8x32xf32>
    %cst_24 = arith.constant dense<0.000000e+00> : vector<8xf32>
    %74 = vector.multi_reduction <add>, %73, %cst_24 [1] : vector<8x32xf32> to vector<8xf32>
    %75 = vector.shape_cast %74 : vector<8xf32> to vector<8x1xf32>
    %cst_25 = arith.constant 3.200000e+01 : f32
    %76 = vector.broadcast %cst_25 : f32 to vector<8x1xf32>
    %77 = arith.divf %75, %76 : vector<8x1xf32>
    %78 = vector.broadcast %77 : vector<8x1xf32> to vector<8x32xf32>
    %79 = arith.subf %73, %78 : vector<8x32xf32>
    %80 = arith.mulf %79, %79 : vector<8x32xf32>
    %cst_26 = arith.constant dense<0.000000e+00> : vector<8xf32>
    %81 = vector.multi_reduction <add>, %80, %cst_26 [1] : vector<8x32xf32> to vector<8xf32>
    %82 = vector.shape_cast %81 : vector<8xf32> to vector<8x1xf32>
    %cst_27 = arith.constant 3.200000e+01 : f32
    %83 = vector.broadcast %cst_27 : f32 to vector<8x1xf32>
    %84 = arith.divf %82, %83 : vector<8x1xf32>
    %85 = vector.broadcast %77 : vector<8x1xf32> to vector<8x32xf32>
    %86 = arith.subf %73, %85 : vector<8x32xf32>
    %cst_28 = arith.constant 9.99999974E-6 : f32
    %87 = vector.broadcast %cst_28 : f32 to vector<8x1xf32>
    %88 = arith.addf %84, %87 : vector<8x1xf32>
    %89 = math.rsqrt %88 : vector<8x1xf32>
    %90 = vector.broadcast %89 : vector<8x1xf32> to vector<8x32xf32>
    %91 = arith.mulf %86, %90 : vector<8x32xf32>
    %c0_29 = arith.constant 0 : index
    %c0_30 = arith.constant 0 : index
    %92 = vector.load %arg7[%c0_29, %c0_30] : memref<1x32xf32, #tpu.memory_space<vmem>>, vector<1x32xf32>
    %93 = vector.broadcast %92 : vector<1x32xf32> to vector<8x32xf32>
    %94 = arith.mulf %91, %93 : vector<8x32xf32>
    %c0_31 = arith.constant 0 : index
    %c0_32 = arith.constant 0 : index
    %95 = vector.load %arg8[%c0_31, %c0_32] : memref<1x32xf32, #tpu.memory_space<vmem>>, vector<1x32xf32>
    %96 = vector.broadcast %95 : vector<1x32xf32> to vector<8x32xf32>
    %97 = arith.addf %94, %96 : vector<8x32xf32>
    %98 = arith.truncf %97 : vector<8x32xf32> to vector<8x32xbf16>
    %c0_33 = arith.constant 0 : index
    %c0_34 = arith.constant 0 : index
    %99 = vector.load %arg9[%c0_33, %c0_34] : memref<32x64xbf16, #tpu.memory_space<vmem>>, vector<32x64xbf16>
    %cst_35 = arith.constant dense<0.000000e+00> : vector<8x64xf32>
    %100 = tpu.matmul %98, %99, %cst_35 {dimension_numbers = #tpu.dot_dimension_numbers<[1], [0], [0], [1], [0, 0, 1, 1], [], []>} : vector<8x32xbf16>, vector<32x64xbf16>, vector<8x64xf32> -> vector<8x64xf32>
    %c0_36 = arith.constant 0 : index
    %c0_37 = arith.constant 0 : index
    %101 = vector.load %arg10[%c0_36, %c0_37] : memref<1x64xf32, #tpu.memory_space<vmem>>, vector<1x64xf32>
    %102 = vector.broadcast %101 : vector<1x64xf32> to vector<8x64xf32>
    %103 = arith.addf %100, %102 : vector<8x64xf32>
    %cst_38 = arith.constant 5.000000e-01 : f32
    %104 = vector.broadcast %cst_38 : f32 to vector<8x64xf32>
    %105 = arith.mulf %104, %103 : vector<8x64xf32>
    %106 = arith.mulf %103, %103 : vector<8x64xf32>
    %107 = arith.mulf %106, %103 : vector<8x64xf32>
    %cst_39 = arith.constant 4.471500e-02 : f32
    %108 = vector.broadcast %cst_39 : f32 to vector<8x64xf32>
    %109 = arith.mulf %108, %107 : vector<8x64xf32>
    %110 = arith.addf %103, %109 : vector<8x64xf32>
    %cst_40 = arith.constant 0.797884583 : f32
    %111 = vector.broadcast %cst_40 : f32 to vector<8x64xf32>
    %112 = arith.mulf %111, %110 : vector<8x64xf32>
    %113 = math.tanh %112 : vector<8x64xf32>
    %cst_41 = arith.constant 1.000000e+00 : f32
    %114 = vector.broadcast %cst_41 : f32 to vector<8x64xf32>
    %115 = arith.addf %114, %113 : vector<8x64xf32>
    %116 = arith.mulf %105, %115 : vector<8x64xf32>
    %117 = arith.truncf %116 : vector<8x64xf32> to vector<8x64xbf16>
    %c0_42 = arith.constant 0 : index
    %c0_43 = arith.constant 0 : index
    %118 = vector.load %arg11[%c0_42, %c0_43] : memref<64x32xbf16, #tpu.memory_space<vmem>>, vector<64x32xbf16>
    %cst_44 = arith.constant dense<0.000000e+00> : vector<8x32xf32>
    %119 = tpu.matmul %117, %118, %cst_44 {dimension_numbers = #tpu.dot_dimension_numbers<[1], [0], [0], [1], [0, 0, 1, 1], [], []>} : vector<8x64xbf16>, vector<64x32xbf16>, vector<8x32xf32> -> vector<8x32xf32>
    %c0_45 = arith.constant 0 : index
    %c0_46 = arith.constant 0 : index
    %120 = vector.load %arg12[%c0_45, %c0_46] : memref<1x32xf32, #tpu.memory_space<vmem>>, vector<1x32xf32>
    %121 = vector.broadcast %120 : vector<1x32xf32> to vector<8x32xf32>
    %122 = arith.addf %119, %121 : vector<8x32xf32>
    %123 = arith.addf %73, %122 : vector<8x32xf32>
    %c0_47 = arith.constant 0 : index
    %c0_48 = arith.constant 0 : index
    %c0_49 = arith.constant 0 : index
    %124 = vector.load %arg13[%c0_47, %c0_48, %c0_49] : memref<1x8x32xf32, #tpu.memory_space<vmem>>, vector<1x8x32xf32>
    %125 = vector.shape_cast %124 : vector<1x8x32xf32> to vector<8x32xf32>
    %126 = vector.shape_cast %123 : vector<8x32xf32> to vector<1x8x32xf32>
    tpu.vector_store %arg13[%c0_47, %c0_48, %c0_49], %126 {strides = array<i32>} : memref<1x8x32xf32, #tpu.memory_space<vmem>>, vector<1x8x32xf32>,
    return
  }
  func.func @transform_0(%arg0: i32) -> (i32, i32, i32) {
    %c0_i32 = arith.constant 0 : i32
    %c0_i32_0 = arith.constant 0 : i32
    %c0_i32_1 = arith.constant 0 : i32
    return %arg0, %c0_i32, %c0_i32_0 : i32, i32, i32
  }
  func.func @transform_1(%arg0: i32) -> (i32, i32, i32) {
    %c0_i32 = arith.constant 0 : i32
    %c0_i32_0 = arith.constant 0 : i32
    %c0_i32_1 = arith.constant 0 : i32
    return %arg0, %c0_i32, %c0_i32_0 : i32, i32, i32
  }
  func.func @transform_2(%arg0: i32) -> (i32, i32) {
    %c0_i32 = arith.constant 0 : i32
    %c0_i32_0 = arith.constant 0 : i32
    %c0_i32_1 = arith.constant 0 : i32
    return %c0_i32, %c0_i32_0 : i32, i32
  }
  func.func @transform_3(%arg0: i32) -> (i32, i32) {
    %c0_i32 = arith.constant 0 : i32
    %c0_i32_0 = arith.constant 0 : i32
    %c0_i32_1 = arith.constant 0 : i32
    return %c0_i32, %c0_i32_0 : i32, i32
  }
  func.func @transform_4(%arg0: i32) -> (i32, i32, i32) {
    %c0_i32 = arith.constant 0 : i32
    %c0_i32_0 = arith.constant 0 : i32
    %c0_i32_1 = arith.constant 0 : i32
    %c0_i32_2 = arith.constant 0 : i32
    return %c0_i32, %c0_i32_0, %c0_i32_1 : i32, i32, i32
  }
  func.func @transform_5(%arg0: i32) -> (i32, i32) {
    %c0_i32 = arith.constant 0 : i32
    %c0_i32_0 = arith.constant 0 : i32
    %c0_i32_1 = arith.constant 0 : i32
    return %c0_i32, %c0_i32_0 : i32, i32
  }
  func.func @transform_6(%arg0: i32) -> (i32, i32) {
    %c0_i32 = arith.constant 0 : i32
    %c0_i32_0 = arith.constant 0 : i32
    %c0_i32_1 = arith.constant 0 : i32
    return %c0_i32, %c0_i32_0 : i32, i32
  }
  func.func @transform_7(%arg0: i32) -> (i32, i32) {
    %c0_i32 = arith.constant 0 : i32
    %c0_i32_0 = arith.constant 0 : i32
    %c0_i32_1 = arith.constant 0 : i32
    return %c0_i32, %c0_i32_0 : i32, i32
  }
  func.func @transform_8(%arg0: i32) -> (i32, i32) {
    %c0_i32 = arith.constant 0 : i32
    %c0_i32_0 = arith.constant 0 : i32
    %c0_i32_1 = arith.constant 0 : i32
    return %c0_i32, %c0_i32_0 : i32, i32
  }
  func.func @transform_9(%arg0: i32) -> (i32, i32) {
    %c0_i32 = arith.constant 0 : i32
    %c0_i32_0 = arith.constant 0 : i32
    %c0_i32_1 = arith.constant 0 : i32
    return %c0_i32, %c0_i32_0 : i32, i32
  }
  func.func @transform_10(%arg0: i32) -> (i32, i32) {
    %c0_i32 = arith.constant 0 : i32
    %c0_i32_0 = arith.constant 0 : i32
    %c0_i32_1 = arith.constant 0 : i32
    return %c0_i32, %c0_i32_0 : i32, i32
  }
  func.func @transform_11(%arg0: i32) -> (i32, i32) {
    %c0_i32 = arith.constant 0 : i32
    %c0_i32_0 = arith.constant 0 : i32
    %c0_i32_1 = arith.constant 0 : i32
    return %c0_i32, %c0_i32_0 : i32, i32
  }
  func.func @transform_12(%arg0: i32) -> (i32, i32, i32) {
    %c0_i32 = arith.constant 0 : i32
    %c0_i32_0 = arith.constant 0 : i32
    %c0_i32_1 = arith.constant 0 : i32
    return %arg0, %c0_i32, %c0_i32_0 : i32, i32, i32
  }
}

module attributes {stable_mosaic.version = 11 : i64} {
  func.func @_block_kernel(%arg0: i32, %arg1: memref<1x8x32xf32, #tpu.memory_space<vmem>>, %arg2: memref<1x1x8xf32, #tpu.memory_space<vmem>>, %arg3: memref<32x96xbf16, #tpu.memory_space<vmem>>, %arg4: memref<1x96xf32, #tpu.memory_space<vmem>>, %arg5: memref<4x8x32xbf16, #tpu.memory_space<vmem>>, %arg6: memref<1x32xf32, #tpu.memory_space<vmem>>, %arg7: memref<1x32xf32, #tpu.memory_space<vmem>>, %arg8: memref<1x32xf32, #tpu.memory_space<vmem>>, %arg9: memref<32x64xbf16, #tpu.memory_space<vmem>>, %arg10: memref<1x64xf32, #tpu.memory_space<vmem>>, %arg11: memref<64x32xbf16, #tpu.memory_space<vmem>>, %arg12: memref<1x32xf32, #tpu.memory_space<vmem>>, %arg13: memref<1x8x32xf32, #tpu.memory_space<vmem>>) attributes {dimension_semantics = [#tpu.dimension_semantics<parallel>], iteration_bounds = array<i64: 2>, scalar_prefetch = 0 : i64, scratch_operands = 0 : i64, tpu.core_type = #tpu.core_type<tc>, window_params = [{transform_indices = @transform_0, window_bounds = array<i64: 1, 8, 32>}, {transform_indices = @transform_1, window_bounds = array<i64: 1, 1, 8>}, {pipeline_mode = #tpu.pipeline_mode<synchronous>, transform_indices = @transform_2, window_bounds = array<i64: 32, 96>}, {pipeline_mode = #tpu.pipeline_mode<synchronous>, transform_indices = @transform_3, window_bounds = array<i64: 1, 96>}, {pipeline_mode = #tpu.pipeline_mode<synchronous>, transform_indices = @transform_4, window_bounds = array<i64: 4, 8, 32>}, {pipeline_mode = #tpu.pipeline_mode<synchronous>, transform_indices = @transform_5, window_bounds = array<i64: 1, 32>}, {pipeline_mode = #tpu.pipeline_mode<synchronous>, transform_indices = @transform_6, window_bounds = array<i64: 1, 32>}, {pipeline_mode = #tpu.pipeline_mode<synchronous>, transform_indices = @transform_7, window_bounds = array<i64: 1, 32>}, {pipeline_mode = #tpu.pipeline_mode<synchronous>, transform_indices = @transform_8, window_bounds = array<i64: 32, 64>}, {pipeline_mode = #tpu.pipeline_mode<synchronous>, transform_indices = @transform_9, window_bounds = array<i64: 1, 64>}, {pipeline_mode = #tpu.pipeline_mode<synchronous>, transform_indices = @transform_10, window_bounds = array<i64: 64, 32>}, {pipeline_mode = #tpu.pipeline_mode<synchronous>, transform_indices = @transform_11, window_bounds = array<i64: 1, 32>}, {transform_indices = @transform_12, window_bounds = array<i64: 1, 8, 32>}]} {
    %c0 = arith.constant 0 : index
    %c0_0 = arith.constant 0 : index
    %c0_1 = arith.constant 0 : index
    %0 = vector.load %arg1[%c0, %c0_0, %c0_1] : memref<1x8x32xf32, #tpu.memory_space<vmem>>, vector<1x8x32xf32>
    %1 = vector.shape_cast %0 : vector<1x8x32xf32> to vector<8x32xf32>
    %2 = arith.truncf %1 : vector<8x32xf32> to vector<8x32xbf16>
    %c0_2 = arith.constant 0 : index
    %c0_3 = arith.constant 0 : index
    %3 = vector.load %arg3[%c0_2, %c0_3] : memref<32x96xbf16, #tpu.memory_space<vmem>>, vector<32x96xbf16>
    %cst = arith.constant dense<0.000000e+00> : vector<8x96xf32>
    %4 = tpu.matmul %2, %3, %cst {dimension_numbers = #tpu.dot_dimension_numbers<[1], [0], [0], [1], [0, 0, 1, 1], [], []>} : vector<8x32xbf16>, vector<32x96xbf16>, vector<8x96xf32> -> vector<8x96xf32>
    %c0_4 = arith.constant 0 : index
    %c0_5 = arith.constant 0 : index
    %5 = vector.load %arg4[%c0_4, %c0_5] : memref<1x96xf32, #tpu.memory_space<vmem>>, vector<1x96xf32>
    %6 = vector.broadcast %5 : vector<1x96xf32> to vector<8x96xf32>
    %7 = arith.addf %4, %6 : vector<8x96xf32>
    %8 = vector.extract_strided_slice %7 {offsets = [0, 0], sizes = [8, 32], strides = [1, 1]} : vector<8x96xf32> to vector<8x32xf32>
    %cst_6 = arith.constant 0.353553385 : f32
    %9 = vector.broadcast %cst_6 : f32 to vector<8x32xf32>
    %10 = arith.mulf %8, %9 : vector<8x32xf32>
    %11 = vector.extract_strided_slice %7 {offsets = [0, 32], sizes = [8, 32], strides = [1, 1]} : vector<8x96xf32> to vector<8x32xf32>
    %12 = vector.extract_strided_slice %7 {offsets = [0, 64], sizes = [8, 32], strides = [1, 1]} : vector<8x96xf32> to vector<8x32xf32>
    %13 = vector.extract_strided_slice %10 {offsets = [0, 0], sizes = [8, 8], strides = [1, 1]} : vector<8x32xf32> to vector<8x8xf32>
    %14 = vector.extract_strided_slice %10 {offsets = [0, 8], sizes = [8, 8], strides = [1, 1]} : vector<8x32xf32> to vector<8x8xf32>
    %15 = vector.extract_strided_slice %10 {offsets = [0, 16], sizes = [8, 8], strides = [1, 1]} : vector<8x32xf32> to vector<8x8xf32>
    %16 = vector.extract_strided_slice %10 {offsets = [0, 24], sizes = [8, 8], strides = [1, 1]} : vector<8x32xf32> to vector<8x8xf32>
    %17 = vector.shape_cast %13 : vector<8x8xf32> to vector<1x8x8xf32>
    %18 = vector.shape_cast %14 : vector<8x8xf32> to vector<1x8x8xf32>
    %19 = vector.shape_cast %15 : vector<8x8xf32> to vector<1x8x8xf32>
    %20 = vector.shape_cast %16 : vector<8x8xf32> to vector<1x8x8xf32>
    %21 = tpu.concatenate %17, %18, %19, %20 in 0 : vector<1x8x8xf32>, vector<1x8x8xf32>, vector<1x8x8xf32>, vector<1x8x8xf32> -> vector<4x8x8xf32>
    %22 = arith.truncf %21 : vector<4x8x8xf32> to vector<4x8x8xbf16>
    %23 = vector.extract_strided_slice %11 {offsets = [0, 0], sizes = [8, 8], strides = [1, 1]} : vector<8x32xf32> to vector<8x8xf32>
    %24 = vector.extract_strided_slice %11 {offsets = [0, 8], sizes = [8, 8], strides = [1, 1]} : vector<8x32xf32> to vector<8x8xf32>
    %25 = vector.extract_strided_slice %11 {offsets = [0, 16], sizes = [8, 8], strides = [1, 1]} : vector<8x32xf32> to vector<8x8xf32>
    %26 = vector.extract_strided_slice %11 {offsets = [0, 24], sizes = [8, 8], strides = [1, 1]} : vector<8x32xf32> to vector<8x8xf32>
    %27 = vector.shape_cast %23 : vector<8x8xf32> to vector<1x8x8xf32>
    %28 = vector.shape_cast %24 : vector<8x8xf32> to vector<1x8x8xf32>
    %29 = vector.shape_cast %25 : vector<8x8xf32> to vector<1x8x8xf32>
    %30 = vector.shape_cast %26 : vector<8x8xf32> to vector<1x8x8xf32>
    %31 = tpu.concatenate %27, %28, %29, %30 in 0 : vector<1x8x8xf32>, vector<1x8x8xf32>, vector<1x8x8xf32>, vector<1x8x8xf32> -> vector<4x8x8xf32>
    %32 = arith.truncf %31 : vector<4x8x8xf32> to vector<4x8x8xbf16>
    %33 = vector.extract_strided_slice %12 {offsets = [0, 0], sizes = [8, 8], strides = [1, 1]} : vector<8x32xf32> to vector<8x8xf32>
    %34 = vector.extract_strided_slice %12 {offsets = [0, 8], sizes = [8, 8], strides = [1, 1]} : vector<8x32xf32> to vector<8x8xf32>
    %35 = vector.extract_strided_slice %12 {offsets = [0, 16], sizes = [8, 8], strides = [1, 1]} : vector<8x32xf32> to vector<8x8xf32>
    %36 = vector.extract_strided_slice %12 {offsets = [0, 24], sizes = [8, 8], strides = [1, 1]} : vector<8x32xf32> to vector<8x8xf32>
    %37 = vector.shape_cast %33 : vector<8x8xf32> to vector<1x8x8xf32>
    %38 = vector.shape_cast %34 : vector<8x8xf32> to vector<1x8x8xf32>
    %39 = vector.shape_cast %35 : vector<8x8xf32> to vector<1x8x8xf32>
    %40 = vector.shape_cast %36 : vector<8x8xf32> to vector<1x8x8xf32>
    %41 = tpu.concatenate %37, %38, %39, %40 in 0 : vector<1x8x8xf32>, vector<1x8x8xf32>, vector<1x8x8xf32>, vector<1x8x8xf32> -> vector<4x8x8xf32>
    %42 = arith.truncf %41 : vector<4x8x8xf32> to vector<4x8x8xbf16>
    %c0_7 = arith.constant 0 : index
    %c0_8 = arith.constant 0 : index
    %c0_9 = arith.constant 0 : index
    %43 = vector.load %arg2[%c0_7, %c0_8, %c0_9] : memref<1x1x8xf32, #tpu.memory_space<vmem>>, vector<1x1x8xf32>
    %44 = vector.shape_cast %43 : vector<1x1x8xf32> to vector<1x8xf32>
    %cst_10 = arith.constant 0.000000e+00 : f32
    %45 = vector.broadcast %cst_10 : f32 to vector<1x8xf32>
    %46 = arith.cmpf oeq, %44, %45 : vector<1x8xf32>
    %cst_11 = arith.constant -1.000000e+09 : f32
    %cst_12 = arith.constant 0.000000e+00 : f32
    %47 = vector.broadcast %cst_11 : f32 to vector<1x8xf32>
    %48 = vector.broadcast %cst_12 : f32 to vector<1x8xf32>
    %49 = arith.select %46, %47, %48 : vector<1x8xi1>, vector<1x8xf32>
    "tpu.trace_start"() <{level = 10 : i32, message = "hqd,hkd->hqk"}> : () -> ()
    %cst_13 = arith.constant dense<0.000000e+00> : vector<4x8x8xf32>
    %50 = tpu.matmul %22, %32, %cst_13 {dimension_numbers = #tpu.dot_dimension_numbers<[2], [2], [1], [1], [0, 0, 0, 1, 1, 1], [0], [0]>} : vector<4x8x8xbf16>, vector<4x8x8xbf16>, vector<4x8x8xf32> -> vector<4x8x8xf32>
    "tpu.trace_stop"() : () -> ()
    %51 = vector.shape_cast %49 : vector<1x8xf32> to vector<1x1x8xf32>
    %52 = vector.broadcast %51 : vector<1x1x8xf32> to vector<4x8x8xf32>
    %53 = arith.addf %50, %52 : vector<4x8x8xf32>
    %cst_14 = arith.constant dense<0xFF800000> : vector<4x8xf32>
    %54 = vector.multi_reduction <maximumf>, %53, %cst_14 [2] : vector<4x8x8xf32> to vector<4x8xf32>
    %55 = vector.shape_cast %54 : vector<4x8xf32> to vector<4x8x1xf32>
    %56 = vector.broadcast %55 : vector<4x8x1xf32> to vector<4x8x8xf32>
    %57 = arith.subf %53, %56 : vector<4x8x8xf32>
    %58 = math.exp %57 : vector<4x8x8xf32>
    %cst_15 = arith.constant dense<0.000000e+00> : vector<4x8xf32>
    %59 = vector.multi_reduction <add>, %58, %cst_15 [2] : vector<4x8x8xf32> to vector<4x8xf32>
    %60 = vector.shape_cast %59 : vector<4x8xf32> to vector<4x8x1xf32>
    %61 = tpu.reciprocal %60 {approx = true} : vector<4x8x1xf32> -> vector<4x8x1xf32>
    %62 = vector.broadcast %61 : vector<4x8x1xf32> to vector<4x8x8xf32>
    %63 = arith.mulf %58, %62 : vector<4x8x8xf32>
    %64 = arith.truncf %63 : vector<4x8x8xf32> to vector<4x8x8xbf16>
    "tpu.trace_start"() <{level = 10 : i32, message = "hqk,hkd->hqd"}> : () -> ()
    %cst_16 = arith.constant dense<0.000000e+00> : vector<4x8x8xf32>
    %65 = tpu.matmul %64, %42, %cst_16 {dimension_numbers = #tpu.dot_dimension_numbers<[2], [1], [1], [2], [0, 0, 0, 1, 1, 2], [0], [0]>} : vector<4x8x8xbf16>, vector<4x8x8xbf16>, vector<4x8x8xf32> -> vector<4x8x8xf32>
    "tpu.trace_stop"() : () -> ()
    %66 = arith.truncf %65 : vector<4x8x8xf32> to vector<4x8x8xbf16>
    %c0_17 = arith.constant 0 : index
    %c0_18 = arith.constant 0 : index
    %c0_19 = arith.constant 0 : index
    %67 = vector.load %arg5[%c0_17, %c0_18, %c0_19] : memref<4x8x32xbf16, #tpu.memory_space<vmem>>, vector<4x8x32xbf16>
    "tpu.trace_start"() <{level = 10 : i32, message = "hqd,hde->hqe"}> : () -> ()
    %cst_20 = arith.constant dense<0.000000e+00> : vector<4x8x32xf32>
    %68 = tpu.matmul %66, %67, %cst_20 {dimension_numbers = #tpu.dot_dimension_numbers<[2], [1], [1], [2], [0, 0, 0, 1, 1, 2], [0], [0]>} : vector<4x8x8xbf16>, vector<4x8x32xbf16>, vector<4x8x32xf32> -> vector<4x8x32xf32>
    "tpu.trace_stop"() : () -> ()
    %cst_21 = arith.constant dense<0.000000e+00> : vector<8x32xf32>
    %69 = vector.multi_reduction <add>, %68, %cst_21 [0] : vector<4x8x32xf32> to vector<8x32xf32>
    %c0_22 = arith.constant 0 : index
    %c0_23 = arith.constant 0 : index
    %70 = vector.load %arg6[%c0_22, %c0_23] : memref<1x32xf32, #tpu.memory_space<vmem>>, vector<1x32xf32>
    %71 = vector.broadcast %70 : vector<1x32xf32> to vector<8x32xf32>
    %72 = arith.addf %69, %71 : vector<8x32xf32>
    %73 = arith.addf %1, %72 : vector<8x32xf32>
    %cst_24 = arith.constant dense<0.000000e+00> : vector<8xf32>
    %74 = vector.multi_reduction <add>, %73, %cst_24 [1] : vector<8x32xf32> to vector<8xf32>
    %75 = vector.shape_cast %74 : vector<8xf32> to vector<8x1xf32>
    %cst_25 = arith.constant 3.200000e+01 : f32
    %76 = vector.broadcast %cst_25 : f32 to vector<8x1xf32>
    %77 = arith.divf %75, %76 : vector<8x1xf32>
    %78 = vector.broadcast %77 : vector<8x1xf32> to vector<8x32xf32>
    %79 = arith.subf %73, %78 : vector<8x32xf32>
    %80 = arith.mulf %79, %79 : vector<8x32xf32>
    %cst_26 = arith.constant dense<0.000000e+00> : vector<8xf32>
    %81 = vector.multi_reduction <add>, %80, %cst_26 [1] : vector<8x32xf32> to vector<8xf32>
    %82 = vector.shape_cast %81 : vector<8xf32> to vector<8x1xf32>
    %cst_27 = arith.constant 3.200000e+01 : f32
    %83 = vector.broadcast %cst_27 : f32 to vector<8x1xf32>
    %84 = arith.divf %82, %83 : vector<8x1xf32>
    %85 = vector.broadcast %77 : vector<8x1xf32> to vector<8x32xf32>
    %86 = arith.subf %73, %85 : vector<8x32xf32>
    %cst_28 = arith.constant 9.99999974E-6 : f32
    %87 = vector.broadcast %cst_28 : f32 to vector<8x1xf32>
    %88 = arith.addf %84, %87 : vector<8x1xf32>
    %89 = math.rsqrt %88 : vector<8x1xf32>
    %90 = vector.broadcast %89 : vector<8x1xf32> to vector<8x32xf32>
    %91 = arith.mulf %86, %90 : vector<8x32xf32>
    %c0_29 = arith.constant 0 : index
    %c0_30 = arith.constant 0 : index
    %92 = vector.load %arg7[%c0_29, %c0_30] : memref<1x32xf32, #tpu.memory_space<vmem>>, vector<1x32xf32>
    %93 = vector.broadcast %92 : vector<1x32xf32> to vector<8x32xf32>
    %94 = arith.mulf %91, %93 : vector<8x32xf32>
    %c0_31 = arith.constant 0 : index
    %c0_32 = arith.constant 0 : index
    %95 = vector.load %arg8[%c0_31, %c0_32] : memref<1x32xf32, #tpu.memory_space<vmem>>, vector<1x32xf32>
    %96 = vector.broadcast %95 : vector<1x32xf32> to vector<8x32xf32>
    %97 = arith.addf %94, %96 : vector<8x32xf32>
    %98 = arith.truncf %97 : vector<8x32xf32> to vector<8x32xbf16>
    %c0_33 = arith.constant 0 : index
    %c0_34 = arith.constant 0 : index
    %99 = vector.load %arg9[%c0_33, %c0_34] : memref<32x64xbf16, #tpu.memory_space<vmem>>, vector<32x64xbf16>
    %cst_35 = arith.constant dense<0.000000e+00> : vector<8x64xf32>
    %100 = tpu.matmul %98, %99, %cst_35 {dimension_numbers = #tpu.dot_dimension_numbers<[1], [0], [0], [1], [0, 0, 1, 1], [], []>} : vector<8x32xbf16>, vector<32x64xbf16>, vector<8x64xf32> -> vector<8x64xf32>
    %c0_36 = arith.constant 0 : index
    %c0_37 = arith.constant 0 : index
    %101 = vector.load %arg10[%c0_36, %c0_37] : memref<1x64xf32, #tpu.memory_space<vmem>>, vector<1x64xf32>
    %102 = vector.broadcast %101 : vector<1x64xf32> to vector<8x64xf32>
    %103 = arith.addf %100, %102 : vector<8x64xf32>
    %cst_38 = arith.constant 5.000000e-01 : f32
    %104 = vector.broadcast %cst_38 : f32 to vector<8x64xf32>
    %105 = arith.mulf %104, %103 : vector<8x64xf32>
    %106 = arith.mulf %103, %103 : vector<8x64xf32>
    %107 = arith.mulf %106, %103 : vector<8x64xf32>
    %cst_39 = arith.constant 4.471500e-02 : f32
    %108 = vector.broadcast %cst_39 : f32 to vector<8x64xf32>
    %109 = arith.mulf %108, %107 : vector<8x64xf32>
    %110 = arith.addf %103, %109 : vector<8x64xf32>
    %cst_40 = arith.constant 0.797884583 : f32
    %111 = vector.broadcast %cst_40 : f32 to vector<8x64xf32>
    %112 = arith.mulf %111, %110 : vector<8x64xf32>
    %113 = math.tanh %112 : vector<8x64xf32>
    %cst_41 = arith.constant 1.000000e+00 : f32
    %114 = vector.broadcast %cst_41 : f32 to vector<8x64xf32>
    %115 = arith.addf %114, %113 : vector<8x64xf32>
    %116 = arith.mulf %105, %115 : vector<8x64xf32>
    %117 = arith.truncf %116 : vector<8x64xf32> to vector<8x64xbf16>
    %c0_42 = arith.constant 0 : index
    %c0_43 = arith.constant 0 : index
    %118 = vector.load %arg11[%c0_42, %c0_43] : memref<64x32xbf16, #tpu.memory_space<vmem>>, vector<64x32xbf16>
    %cst_44 = arith.constant dense<0.000000e+00> : vector<8x32xf32>
    %119 = tpu.matmul %117, %118, %cst_44 {dimension_numbers = #tpu.dot_dimension_numbers<[1], [0], [0], [1], [0, 0, 1, 1], [], []>} : vector<8x64xbf16>, vector<64x32xbf16>, vector<8x32xf32> -> vector<8x32xf32>
    %c0_45 = arith.constant 0 : index
    %c0_46 = arith.constant 0 : index
    %120 = vector.load %arg12[%c0_45, %c0_46] : memref<1x32xf32, #tpu.memory_space<vmem>>, vector<1x32xf32>
    %121 = vector.broadcast %120 : vector<1x32xf32> to vector<8x32xf32>
    %122 = arith.addf %119, %121 : vector<8x32xf32>
    %123 = arith.addf %73, %122 : vector<8x32xf32>
    %c0_47 = arith.constant 0 : index
    %c0_48 = arith.constant 0 : index
    %c0_49 = arith.constant 0 : index
    %124 = vector.load %arg13[%c0_47, %c0_48, %c0_49] : memref<1x8x32xf32, #tpu.memory_space<vmem>>, vector<1x8x32xf32>
    %125 = vector.shape_cast %124 : vector<1x8x32xf32> to vector<8x32xf32>
    %126 = vector.shape_cast %123 : vector<8x32xf32> to vector<1x8x32xf32>
    tpu.vector_store %arg13[%c0_47, %c0_48, %c0_49], %126 {strides = array<i32>} : memref<1x8x32xf32, #tpu.memory_space<vmem>>, vector<1x8x32xf32>,
    return
  }
  func.func @transform_0(%arg0: i32) -> (i32, i32, i32) {
    %c0_i32 = arith.constant 0 : i32
    %c0_i32_0 = arith.constant 0 : i32
    %c0_i32_1 = arith.constant 0 : i32
    return %arg0, %c0_i32, %c0_i32_0 : i32, i32, i32
  }
  func.func @transform_1(%arg0: i32) -> (i32, i32, i32) {
    %c0_i32 = arith.constant 0 : i32
    %c0_i32_0 = arith.constant 0 : i32
    %c0_i32_1 = arith.constant 0 : i32
    return %arg0, %c0_i32, %c0_i32_0 : i32, i32, i32
  }
  func.func @transform_2(%arg0: i32) -> (i32, i32) {
    %c0_i32 = arith.constant 0 : i32
    %c0_i32_0 = arith.constant 0 : i32
    %c0_i32_1 = arith.constant 0 : i32
    return %c0_i32, %c0_i32_0 : i32, i32
  }
  func.func @transform_3(%arg0: i32) -> (i32, i32) {
    %c0_i32 = arith.constant 0 : i32
    %c0_i32_0 = arith.constant 0 : i32
    %c0_i32_1 = arith.constant 0 : i32
    return %c0_i32, %c0_i32_0 : i32, i32
  }
  func.func @transform_4(%arg0: i32) -> (i32, i32, i32) {
    %c0_i32 = arith.constant 0 : i32
    %c0_i32_0 = arith.constant 0 : i32
    %c0_i32_1 = arith.constant 0 : i32
    %c0_i32_2 = arith.constant 0 : i32
    return %c0_i32, %c0_i32_0, %c0_i32_1 : i32, i32, i32
  }
  func.func @transform_5(%arg0: i32) -> (i32, i32) {
    %c0_i32 = arith.constant 0 : i32
    %c0_i32_0 = arith.constant 0 : i32
    %c0_i32_1 = arith.constant 0 : i32
    return %c0_i32, %c0_i32_0 : i32, i32
  }
  func.func @transform_6(%arg0: i32) -> (i32, i32) {
    %c0_i32 = arith.constant 0 : i32
    %c0_i32_0 = arith.constant 0 : i32
    %c0_i32_1 = arith.constant 0 : i32
    return %c0_i32, %c0_i32_0 : i32, i32
  }
  func.func @transform_7(%arg0: i32) -> (i32, i32) {
    %c0_i32 = arith.constant 0 : i32
    %c0_i32_0 = arith.constant 0 : i32
    %c0_i32_1 = arith.constant 0 : i32
    return %c0_i32, %c0_i32_0 : i32, i32
  }
  func.func @transform_8(%arg0: i32) -> (i32, i32) {
    %c0_i32 = arith.constant 0 : i32
    %c0_i32_0 = arith.constant 0 : i32
    %c0_i32_1 = arith.constant 0 : i32
    return %c0_i32, %c0_i32_0 : i32, i32
  }
  func.func @transform_9(%arg0: i32) -> (i32, i32) {
    %c0_i32 = arith.constant 0 : i32
    %c0_i32_0 = arith.constant 0 : i32
    %c0_i32_1 = arith.constant 0 : i32
    return %c0_i32, %c0_i32_0 : i32, i32
  }
  func.func @transform_10(%arg0: i32) -> (i32, i32) {
    %c0_i32 = arith.constant 0 : i32
    %c0_i32_0 = arith.constant 0 : i32
    %c0_i32_1 = arith.constant 0 : i32
    return %c0_i32, %c0_i32_0 : i32, i32
  }
  func.func @transform_11(%arg0: i32) -> (i32, i32) {
    %c0_i32 = arith.constant 0 : i32
    %c0_i32_0 = arith.constant 0 : i32
    %c0_i32_1 = arith.constant 0 : i32
    return %c0_i32, %c0_i32_0 : i32, i32
  }
  func.func @transform_12(%arg0: i32) -> (i32, i32, i32) {
    %c0_i32 = arith.constant 0 : i32
    %c0_i32_0 = arith.constant 0 : i32
    %c0_i32_1 = arith.constant 0 : i32
    return %arg0, %c0_i32, %c0_i32_0 : i32, i32, i32
  }
}

</mosaic_0001>

<bundles_post_ra>
// kernel: encoder_forward.3
= control target key start
LH: loop header
LB: loop body
LE: loop exit
PB: predicated region body
PF: predicated region fallthrough
CT: control target
= control target key end

     0   :  { %s1538_s0 = inlined_call_operand.vmem [shape: f32[2,8,32], index: 0, kind: input, shape index: {}]   ;;  %s1539_s1 = inlined_call_operand.vmem [shape: f32[2,1,8], index: 1, kind: input, shape index: {}]   ;;  %s1540_s2 = inlined_call_operand.vmem [shape: bf16[32,96], index: 2, kind: input, shape index: {}]   ;;  %s1541_s3 = inlined_call_operand.vmem [shape: f32[1,96], index: 3, kind: input, shape index: {}]   ;;  %s1542_s4 = inlined_call_operand.vmem [shape: bf16[4,8,32], index: 4, kind: input, shape index: {}]   ;;  %s1543_s5 = inlined_call_operand.vmem [shape: f32[1,32], index: 5, kind: input, shape index: {}]   ;;  %s1544_s6 = inlined_call_operand.vmem [shape: f32[1,32], index: 6, kind: input, shape index: {}]   ;;  %s1545_s7 = inlined_call_operand.vmem [shape: f32[1,32], index: 7, kind: input, shape index: {}]   ;;  %s1546_s8 = inlined_call_operand.vmem [shape: bf16[32,64], index: 8, kind: input, shape index: {}]   ;;  %s1547_s9 = inlined_call_operand.vmem [shape: f32[1,64], index: 9, kind: input, shape index: {}]   ;;  %s1548_s10 = inlined_call_operand.vmem [shape: bf16[64,32], index: 10, kind: input, shape index: {}]   ;;  %s1549_s11 = inlined_call_operand.vmem [shape: f32[1,32], index: 11, kind: input, shape index: {}]   ;;  %s1550_s12 = inlined_call_operand.hbm [shape: f32[2,8,32], index: 12, kind: output, shape index: {}]  }
   0x1   :  { %1551 = sst [smem:[#allocation5_spill]] %s1538_s0 }
   0x2   :  { %1552 = sst [smem:[#allocation6_spill]] %s1539_s1 }
   0x3   :  { %1553 = sst [smem:[#allocation7_spill]] %s1540_s2 }
   0x4   :  { %17 = vsyncpa [#allocation3], 0 }
   0x5   :  { %19 = vsyncpa [#allocation3 + $0x1], 0  ;;  %s1325_s21 = smov 0   ;;  %s1327_s22 = smov 0  }
   0x6   :  { %s1329_s23 = smov 0   ;;  %s1331_s24 = smov 0  }
   0x7 LB: > { %s1346_s25 = sadd.s32 4294967295, %s1251_s24   ;;  %s1050_s26 = sadd.s32 4294967294, %s1251_s24   ;;  %s1251_s24 = sphi %s1331_s24, %s1562_s24   ;;  %s1247_s23 = sphi %s1329_s23, %s1561_s23   ;;  %s1243_s22 = sphi %s1327_s22, %s1560_s22   ;;  %s1239_s21 = sphi %s1325_s21, %s1559_s21  }
   0x8   : > { %s1350_s27 = sadd.s32 1, %s1251_s24   ;;  %s294_s28 = sadd.s32 1, %s1247_s23 }
   0x9   : > { %s291_s29 = ssub.s32 %s1251_s24, %s1350_s27  ;;  %p304_p0 = scmp.ne.s32.totalorder %s1247_s23, %s1243_s22 }
   0xa   : > { %p292_p1 = scmp.eq.s32.totalorder %s291_s29, 0  ;;  %p305_p2 = scmp.eq.s32.totalorder %s1346_s25, 1 }
   0xb   : > { %p310_p3 = scmp.ne.s32.totalorder %s1243_s22, %s1239_s21  ;;  %p311_p4 = scmp.eq.s32.totalorder %s1050_s26, 1 }
   0xc   : > { %s1361_s30 = scalar_select %p292_p1, %s1247_s23, %s294_s28  }
   0xd   : > { %p1363_p5 = por %p305_p2, %p304_p0  ;;  %p1367_p6 = por %p311_p4, %p310_p3 }
   0xe   : > { %p1053_p7 = scmp.ge.s32.totalorder %s1251_s24, 1  ;;  %p372_p8 = scmp.lt.s32.totalorder %s1251_s24, 3 }
  0x10   : > { %p373_p9 = pnand %p1053_p7, %p372_p8 }
  0x11   : > { %s1556_s2 = sld [smem:[#allocation7_spill]] (!%p373_p9)  ;;  %p416_p10 = scmp.lt.s32.totalorder (!%p373_p9), %s1346_s25, 1 }
  0x12   : > { %376 = sbr.rel (%p373_p9) target bundleno = 1647 (0x66f), region = 68  ;;  %s1557_s0 = sld [smem:[#allocation5_spill]] (!%p373_p9) }
  0x13   : > { %s1253_s17 = smov (!%p373_p9), 104   ;;  %s1254_s18 = smov (!%p373_p9), 120  }
  0x14   : > { %s1256_s26 = smov (!%p373_p9), 96   ;;  %s1558_s1 = sld [smem:[#allocation6_spill]] (!%p373_p9) }
  0x17   : > { %v1108_v0 = vld [vmem:[%s1556_s2 + $0x8] sm:$0xff]  ;;  %v1107_v1 = vld [vmem:[%s1556_s2] sm:$0xff]  ;;  %s1381_s19 = scalar_select %p416_p10, %s1346_s25, 1  ;;  %vm446_vm0 = vcmask 261120   ;;  %vm503_vm1 = vcmask 64512   ;;  %v1257_v40 = vmov 0.0  }
  0x18   : > { %456 = vmatpush.bf16.msra.mxu0 %v1108_v0  ;;  %v1161_v4 = vld [vmem:[%s1541_s3] ss:$0 sm:$0xff]  ;;  %vm648_vm3 = vcmask 1043456   ;;  %vm947_vm8 = vcmask 523264  }
  0x19   : > { %s1055_s20 = sshll.u32 %s1381_s19, 3 }
  0x1a   : > { %s419_s29 = scalar_lea.vmem %s1557_s0, %s1055_s20  ;;  %s1255_s20 = smov 112  }
  0x1b   : > { %v1387_v2 = vld [vmem:[%s419_s29] sm:$0xff]  ;;  %s422_s15 = scalar_lea.vmem %s1558_s1, %s1381_s19  ;;  %s1258_s19 = smov 64  }
  0x1c   : > { %457 = vmatpush.bf16.msra.mxu0 %v1107_v1  ;;  %v425_v3 = vpack.c.bf16 %v1387_v2, %v1387_v2  ;;  %v492_v39 = vld [vmem:[%s422_s15] sm:$0x1]  ;;  %s413_s0 = sand.u32 1, %s1243_s22  }
  0x1d   : > { %vm493_vm2 = vcmp.eq.f32.partialorder %v492_v39, 0.0  ;;  %s1054_s16 = sshll.u32 %s413_s0, 3 }
  0x1e   : > { %v494_v41 = vsel %vm493_vm2, -1e+09, %v1257_v40  ;;  %v732_v40 = vld [vmem:[%s1542_s4] sm:$0xf]  ;;  %s415_s15 = scalar_lea.vmem [#allocation2], %s1054_s16  ;;  %s1209_s16 = scalar_lea.hbm %s1550_s12, 16 }
  0x1f   : > { %1064 = vmatmul.msk.bf16.vlgmr.msra.gmra.mxu0 %vm446_vm0, %v425_v3  ;;  %v496_v42 = vperm.slane %v494_v41, 0  ;;  %v740_v41 = vsel %vm648_vm3, %v732_v40, 0 }
  0x9c   : > { %v459_v5 = vpop.f32.mrf.mxu0 }
  0x9d   : > { %v460_v6 = vadd.f32 %v1161_v4, %v459_v5 }
  0x9f   : > { %485 = vrot.lane.b32.xlu1 %v460_v6, %s1253_s17  ;;  %479 = vrot.lane.b32.xlu0 %v460_v6, %s1254_s18  ;;  %v463_v8 = vmul.f32 0.35355338, %v460_v6  ;;  %v488_v13 = vpack.c.bf16 %v460_v6, %v460_v6 }
  0xa1   : > { %v499_v16 = vunpack.c.l.b16 %v488_v13  ;;  %v474_v38 = vpack.c.bf16 %v463_v8, %v463_v8 }
  0xa3   : > { %v500_v19 = vpack.c.b16 %v499_v16, %v499_v16 }
  0xa4   : > { %v461_v7 = vpop.f32.mrf.mxu0 }
  0xa7   : > { %482 = vrot.lane.b32.xlu0 %v460_v6, %s1255_s20 }
  0xaf   : > { %468 = vrot.lane.b32.xlu0 %v463_v8, %s1255_s20 }
  0xb7   : > { %471 = vrot.lane.b32.xlu0 %v463_v8, %s1253_s17  ;;  %s1104_s17 = sshll.u32 %s1346_s25, 3  ;;  %s967_s25 = scalar_lea.sflag [#allocation3], %s413_s0 }
  0xb8   : > { %s977_s29 = scalar_lea.hbm %s1550_s12, %s1104_s17 }
  0xb9   : > { %s981_s1 = sshll.u32 %s977_s29, 4  ;;  %s982_s1 = int_to_ptr.hbm [resolvable:$true] %s981_s1 }
  0xba   : > { %s1203_s2 = sshra.s32 %s982_s1, 4  ;;  %s1204_s2 = int_to_ptr.hbm [resolvable:$true] %s1203_s2 }
  0xbb   : > { %p1210_p0 = scmp.lt.s32.totalorder %s1204_s2, %s1550_s12 }
 0x111   : > { %v480_v9 = vpop.permute.xlu0 %479  ;;  %v486_v20 = vpop.permute.xlu1 %485 }
 0x112   : > { %v489_v10 = vpack.c.bf16 %v480_v9, %v480_v9  ;;  %v491_v21 = vpack.c.bf16 %v486_v20, %v486_v20 }
 0x114   : > { %v524_v11 = vunpack.c.l.b16 %v489_v10  ;;  %v572_v22 = vunpack.c.l.b16 %v491_v21 }
 0x116   : > { %v1395_v12 = vpack.c.b16 %v524_v11, %v524_v11  ;;  %v1401_v23 = vpack.c.b16 %v572_v22, %v572_v22 }
 0x118   : > { %526 = vrot.lane.b32.xlu1 %v1395_v12, %s1256_s26 }
 0x119   : > { %v483_v14 = vpop.permute.xlu0 %482 }
 0x11a   : > { %v490_v15 = vpack.c.bf16 %v483_v14, %v483_v14 }
 0x11c   : > { %v548_v17 = vunpack.c.l.b16 %v490_v15 }
 0x11e   : > { %v1398_v18 = vpack.c.b16 %v548_v17, %v548_v17 }
 0x120   : > { %550 = vrot.lane.b32.xlu2 %v1398_v18, %s1256_s26  ;;  %501 = vrot.lane.b32.xlu1 %v500_v19, %s1256_s26 }
 0x121   : > { %v469_v26 = vpop.permute.xlu0 %468 }
 0x122   : > { %v476_v27 = vpack.c.bf16 %v469_v26, %v469_v26 }
 0x128   : > { %465 = vrot.lane.b32.xlu2 %v463_v8, %s1254_s18  ;;  %s1205_s18 = scalar_lea.hbm %s1204_s2, 8 }
 0x129   : > { %v472_v33 = vpop.permute.xlu0 %471  ;;  %p1206_p11 = scmp.ne.s32.totalorder %s1204_s2, %s1205_s18  ;;  %p1211_p1 = scmp.lt.s32.totalorder %s1209_s16, %s1205_s18 }
 0x12a   : > { %v477_v34 = vpack.c.bf16 %v472_v33, %v472_v33 }
 0x12b   : > { %p1207_p12 = pnand %p1206_p11, %p1363_p5  ;;  %p1212_p2 = por %p1211_p1, %p1210_p0 }
 0x12d   : > { %p1208_p13 = pneg %p1207_p12 }
 0x12f   : > { %p1213_p3 = pnand %p1212_p2, %p1208_p13 }
 0x130   : > { %574 = vrot.lane.b32.xlu2 %v1401_v23, %s1256_s26 }
 0x17a   : > { %v551_v24 = vpop.permute.xlu2 %550 }
 0x17b   : > { %v556_v25 = vsel %vm503_vm1, %v551_v24, 0 }
 0x17c   : > { %565 = vmatpush.bf16.xpose.msra.mxu3 %v556_v25 }
 0x182   : > { %v466_v28 = vpop.permute.xlu2 %465 }
 0x183   : > { %1067 = vmatmul.msk.bf16.vlgmr.msra.gmra.mxu3 %vm503_vm1, %v476_v27  ;;  %v475_v35 = vpack.c.bf16 %v466_v28, %v466_v28 }
 0x18a   : > { %v527_v29 = vpop.permute.xlu1 %526  ;;  %v575_v30 = vpop.permute.xlu2 %574 }
 0x18b   : > { %v532_v31 = vsel %vm503_vm1, %v527_v29, 0  ;;  %v580_v32 = vsel %vm503_vm1, %v575_v30, 0 }
 0x18c   : > { %541 = vmatpush.bf16.xpose.msra.mxu2 %v532_v31  ;;  %589 = vmatpush.bf16.xpose.msrb.mxu0 %v580_v32 }
 0x192   : > { %v502_v36 = vpop.permute.xlu1 %501 }
 0x193   : > { %1066 = vmatmul.msk.bf16.vlgmr.msra.gmra.mxu2 %vm503_vm1, %v475_v35  ;;  %1068 = vmatmul.msk.bf16.vlgmr.msrb.gmra.mxu0 %vm503_vm1, %v477_v34  ;;  %v508_v37 = vsel %vm503_vm1, %v502_v36, 0 }
 0x194   : > { %517 = vmatpush.bf16.xpose.msra.mxu1 %v508_v37 }
 0x19b   : > { %1065 = vmatmul.msk.bf16.vlgmr.msra.gmra.mxu1 %vm503_vm1, %v474_v38 }
 0x206   : > { %v567_v43 = vpop.f32.mrf.mxu3 }
 0x207   : > { %v568_v44 = vadd.f32 %v567_v43, %v496_v42 }
 0x209   : > { %v601_v45 = vsel %vm503_vm1, %v568_v44, -inf }
 0x20a   : > { %602 = vmax.xlane.f32.xlu2 %v601_v45 }
 0x20e   : > { %v569_v46 = vpop.f32.mrf.mxu3 }
 0x20f   : > { %v734_v46 = vld [vmem:[%s1542_s4 + $0x8] sm:$0xf] }
 0x210   : > { %v591_v47 = vpop.f32.mrf.mxu0 }
 0x211   : > { %v592_v48 = vadd.f32 %v591_v47, %v496_v42  ;;  %v778_v47 = vsel %vm648_vm3, %v734_v46, 0  ;;  %v1113_v46 = vld [vmem:[%s1548_s10 + $0x10] sm:$0xff] }
 0x213   : > { %v604_v49 = vsel %vm503_vm1, %v592_v48, -inf }
 0x214   : > { %605 = vmax.xlane.f32.xlu2 %v604_v49 }
 0x216   : > { %v543_v50 = vpop.f32.mrf.mxu2 }
 0x217   : > { %v544_v51 = vadd.f32 %v543_v50, %v496_v42 }
 0x218   : > { %v519_v52 = vpop.f32.mrf.mxu1  ;;  %v593_v53 = vpop.f32.mrf.mxu0 }
 0x219   : > { %v520_v54 = vadd.f32 %v519_v52, %v496_v42  ;;  %v598_v55 = vsel %vm503_vm1, %v544_v51, -inf  ;;  %v733_v42 = vld [vmem:[%s1542_s4 + $0x4] sm:$0xf] }
 0x21a   : > { %599 = vmax.xlane.f32.xlu1 %v598_v55  ;;  %v759_v43 = vsel %vm648_vm3, %v733_v42, 0 }
 0x21b   : > { %v595_v56 = vsel %vm503_vm1, %v520_v54, -inf }
 0x21c   : > { %596 = vmax.xlane.f32.xlu0 %v595_v56 }
 0x21e   : > { %v545_v57 = vpop.f32.mrf.mxu2 }
 0x220   : > { %v521_v58 = vpop.f32.mrf.mxu1 }
 0x230   : > { %665 = vrot.lane.b32.xlu0 %v1395_v12, %s1258_s19 }
 0x238   : > { %643 = vrot.lane.b32.xlu0 %v500_v19, %s1258_s19 }
 0x27d   : > { %v603_v59 = vpop.xlane.xlu2 %602 }
 0x27e   : > { %v609_v9 = vsub.f32 %v568_v44, %v603_v59  ;;  %v735_v44 = vld [vmem:[%s1542_s4 + $0xc] sm:$0xf] }
 0x27f   : > { %v797_v45 = vsel %vm648_vm3, %v735_v44, 0 }
 0x280   : > { %v615_v11 = vmul.f32 1.442695, %v609_v9  ;;  %v1162_v9 = vld [vmem:[%s1543_s5] ss:$0 sm:$0xff] }
 0x287   : > { %v606_v62 = vpop.xlane.xlu2 %605 }
 0x288   : > { %v610_v3 = vsub.f32 %v592_v48, %v606_v62 }
 0x28a   : > { %v617_v5 = vmul.f32 1.442695, %v610_v3 }
 0x28d   : > { %v600_v60 = vpop.xlane.xlu1 %599 }
 0x28e   : > { %v608_v61 = vsub.f32 %v544_v51, %v600_v60 }
 0x28f   : > { %v597_v63 = vpop.xlane.xlu0 %596 }
 0x290   : > { %v613_v0 = vmul.f32 1.442695, %v608_v61  ;;  %v607_v1 = vsub.f32 %v520_v54, %v597_v63 }
 0x292   : > { %1167 = vpow2.f32 %v613_v0  ;;  %v611_v4 = vmul.f32 1.442695, %v607_v1 }
 0x294   : > { %1169 = vpow2.f32 %v611_v4 }
 0x295   : > { %1171 = vpow2.f32 %v617_v5 }
 0x296   : > { %1173 = vpow2.f32 %v615_v11 }
 0x298   : > { %v1168_v6 = vpop.eup %1167 }
 0x299   : > { %v622_v7 = vsel %vm503_vm1, %v1168_v6, 0.0 }
 0x29a   : > { %v1170_v8 = vpop.eup %1169  ;;  %623 = vadd.xlane.f32.xlu1 %v622_v7 }
 0x29b   : > { %v619_v10 = vsel %vm503_vm1, %v1170_v8, 0.0  ;;  %v1172_v12 = vpop.eup %1171 }
 0x29c   : > { %620 = vadd.xlane.f32.xlu2 %v619_v10  ;;  %v628_v14 = vsel %vm503_vm1, %v1172_v12, 0.0  ;;  %v1174_v16 = vpop.eup %1173 }
 0x29d   : > { %v625_v19 = vsel %vm503_vm1, %v1174_v16, 0.0 }
 0x2a2   : > { %v666_v13 = vpop.permute.xlu0 %665 }
 0x2a3   : > { %v671_v15 = vsel %vm648_vm3, %v666_v13, 0 }
 0x2a4   : > { %629 = vadd.xlane.f32.xlu2 %v628_v14  ;;  %680 = vmatpush.bf16.msrb.mxu2 %v671_v15 }
 0x2a8   : > { %768 = vmatpush.bf16.msra.mxu2 %v759_v43 }
 0x2aa   : > { %v644_v17 = vpop.permute.xlu0 %643 }
 0x2ab   : > { %v650_v20 = vsel %vm648_vm3, %v644_v17, 0 }
 0x2ac   : > { %626 = vadd.xlane.f32.xlu2 %v625_v19  ;;  %659 = vmatpush.bf16.msrb.mxu1 %v650_v20 }
 0x2b0   : > { %749 = vmatpush.bf16.msra.mxu1 %v740_v41  ;;  %v1164_v41 = vld [vmem:[%s1545_s7] ss:$0 sm:$0xff] }
 0x2b3   : > { %686 = vrot.lane.b32.xlu1 %v1398_v18, %s1258_s19 }
 0x2c4   : > { %707 = vrot.lane.b32.xlu2 %v1401_v23, %s1258_s19  ;;  %s979_s19 = sshll.u32 %s415_s15, 4  ;;  %s980_s19 = int_to_ptr.vmem [resolvable:$true] %s979_s19 }
 0x30d   : > { %v624_v21 = vpop.xlane.xlu1 %623 }
 0x30e   : > { %1175 = vrcp.f32 %v624_v21 }
 0x30f   : > { %v621_v22 = vpop.xlane.xlu2 %620 }
 0x310   : > { %1177 = vrcp.f32 %v621_v22 }
 0x314   : > { %v1176_v24 = vpop.eup %1175 }
 0x315   : > { %v636_v25 = vmul.f32 %v1176_v24, %v1168_v6 }
 0x316   : > { %v1178_v26 = vpop.eup %1177 }
 0x317   : > { %v635_v27 = vmul.f32 %v1178_v26, %v1170_v8  ;;  %v630_v28 = vpop.xlane.xlu2 %629  ;;  %v640_v29 = vpack.c.bf16 %v636_v25, %v636_v25 }
 0x318   : > { %1179 = vrcp.f32 %v630_v28 }
 0x319   : > { %1070 = vmatmul.msk.bf16.vlgmr.msrb.gmra.mxu2 %vm503_vm1, %v640_v29  ;;  %v639_v30 = vpack.c.bf16 %v635_v27, %v635_v27  ;;  %v1110_v29 = vld [vmem:[%s1546_s8 + $0x8] sm:$0xff] }
 0x31b   : > { %1069 = vmatmul.msk.bf16.vlgmr.msrb.gmra.mxu1 %vm503_vm1, %v639_v30  ;;  %v1109_v30 = vld [vmem:[%s1546_s8] sm:$0xff] }
 0x31c   : > { %894 = vmatpush.bf16.msrb.mxu1 %v1110_v29 }
 0x31e   : > { %v1180_v31 = vpop.eup %1179 }
 0x31f   : > { %v627_v18 = vpop.xlane.xlu2 %626  ;;  %v638_v33 = vmul.f32 %v1180_v31, %v1172_v12 }
 0x320   : > { %1181 = vrcp.f32 %v627_v18  ;;  %895 = vmatpush.bf16.msrb.mxu1 %v1109_v30 }
 0x321   : > { %v642_v39 = vpack.c.bf16 %v638_v33, %v638_v33 }
 0x325   : > { %v687_v23 = vpop.permute.xlu1 %686 }
 0x326   : > { %v1182_v32 = vpop.eup %1181  ;;  %v692_v34 = vsel %vm648_vm3, %v687_v23, 0 }
 0x327   : > { %v637_v35 = vmul.f32 %v1182_v32, %v1174_v16  ;;  %701 = vmatpush.bf16.msrb.mxu3 %v692_v34  ;;  %v708_v36 = vpop.permute.xlu2 %707  ;;  %v1259_v16 = vmov 32.0  }
 0x328   : > { %v713_v37 = vsel %vm648_vm3, %v708_v36, 0  ;;  %1183 = vrcp.f32 %v1259_v16 }
 0x329   : > { %722 = vmatpush.bf16.msra.mxu0 %v713_v37  ;;  %v641_v38 = vpack.c.bf16 %v637_v35, %v637_v35 }
 0x32b   : > { %1071 = vmatmul.msk.bf16.vlgmr.msrb.gmra.mxu3 %vm503_vm1, %v641_v38  ;;  %v1163_v38 = vld [vmem:[%s1544_s6] ss:$0 sm:$0xff] }
 0x32c   : > { %1072 = vmatmul.msk.bf16.vlgmr.msra.gmra.mxu0 %vm503_vm1, %v642_v39  ;;  %787 = vmatpush.bf16.msra.mxu3 %v778_v47  ;;  %v1112_v47 = vld [vmem:[%s1548_s10 + $0x8] sm:$0xff] }
 0x32d   : > { %806 = vmatpush.bf16.msrb.mxu0 %v797_v45  ;;  %v1114_v45 = vld [vmem:[%s1548_s10 + $0x18] sm:$0xff] }
 0x32e   : > { %v1184_v17 = vpop.eup %1183  ;;  %955 = vmatpush.bf16.msrb.mxu2 %v1114_v45 }
 0x32f   : > { %v829_v19 = vmul.f32 32.0, %v1184_v17  ;;  %vm833_vm4 = vweird.f32 %v1184_v17 }
 0x331   : > { %v830_v20 = vsub.f32 1.0, %v829_v19 }
 0x332   : > { %956 = vmatpush.bf16.msrb.mxu2 %v1113_v46 }
 0x333   : > { %v831_v21 = vmul.f32 %v1184_v17, %v830_v20 }
 0x335   : > { %v832_v22 = vadd.f32 %v1184_v17, %v831_v21 }
 0x336   : > { %957 = vmatpush.bf16.msrb.mxu2 %v1112_v47 }
 0x337   : > { %v834_v24 = vsel %vm833_vm4, %v1184_v17, %v832_v22 }
 0x398   : > { %v661_v48 = vpop.f32.mrf.mxu1 }
 0x399   : > { %v728_v49 = vpack.c.bf16 %v661_v48, %v661_v48  ;;  %v1111_v48 = vld [vmem:[%s1548_s10] sm:$0xff] }
 0x39a   : > { %958 = vmatpush.bf16.msrb.mxu2 %v1111_v48 }
 0x39b   : > { %1073 = vmatmul.msk.bf16.vlgmr.msra.gmra.mxu1 %vm503_vm1, %v728_v49  ;;  %v1165_v49 = vld [vmem:[%s1547_s9] ss:$0 sm:$0xff] }
 0x39c   : > { %v682_v50 = vpop.f32.mrf.mxu2 }
 0x39d   : > { %v729_v51 = vpack.c.bf16 %v682_v50, %v682_v50 }
 0x39f   : > { %1074 = vmatmul.msk.bf16.vlgmr.msra.gmra.mxu2 %vm503_vm1, %v729_v51 }
 0x3a0   : > { %v663_v52 = vpop.f32.mrf.mxu1 }
 0x3a4   : > { %v684_v53 = vpop.f32.mrf.mxu2 }
 0x3a9   : > { %v724_v54 = vpop.f32.mrf.mxu0 }
 0x3aa   : > { %v731_v55 = vpack.c.bf16 %v724_v54, %v724_v54 }
 0x3ac   : > { %1076 = vmatmul.msk.bf16.vlgmr.msrb.gmra.mxu0 %vm503_vm1, %v731_v55 }
 0x3ae   : > { %v703_v56 = vpop.f32.mrf.mxu3 }
 0x3af   : > { %v730_v57 = vpack.c.bf16 %v703_v56, %v703_v56 }
 0x3b1   : > { %v726_v58 = vpop.f32.mrf.mxu0  ;;  %1075 = vmatmul.msk.bf16.vlgmr.msra.gmra.mxu3 %vm503_vm1, %v730_v57 }
 0x3b6   : > { %v705_v59 = vpop.f32.mrf.mxu3 }
 0x418   : > { %v751_v60 = vpop.f32.mrf.mxu1 }
 0x419   : > { %v812_v4 = vsel %vm446_vm0, %v751_v60, 0.0 }
 0x420   : > { %v753_v61 = vpop.f32.mrf.mxu1 }
 0x422   : > { %v770_v62 = vpop.f32.mrf.mxu2 }
 0x423   : > { %v813_v1 = vsel %vm446_vm0, %v770_v62, 0.0 }
 0x424   : > { %v814_v5 = vadd.f32 %v813_v1, %v812_v4 }
 0x429   : > { %v808_v63 = vpop.f32.mrf.mxu0 }
 0x42a   : > { %v772_v0 = vpop.f32.mrf.mxu2  ;;  %v817_v10 = vsel %vm446_vm0, %v808_v63, 0.0  ;;  %v1166_v63 = vld [vmem:[%s1549_s11] ss:$0 sm:$0xff] }
 0x431   : > { %v810_v3 = vpop.f32.mrf.mxu0 }
 0x434   : > { %v789_v6 = vpop.f32.mrf.mxu3 }
 0x435   : > { %v815_v7 = vsel %vm446_vm0, %v789_v6, 0.0 }
 0x436   : > { %v816_v8 = vadd.f32 %v815_v7, %v814_v5 }
 0x438   : > { %v818_v11 = vadd.f32 %v817_v10, %v816_v8 }
 0x43a   : > { %v823_v12 = vadd.f32 %v1162_v9, %v818_v11 }
 0x43c   : > { %v791_v13 = vpop.f32.mrf.mxu3  ;;  %v1467_v14 = vadd.f32 %v823_v12, %v1387_v2 }
 0x43e   : > { %v825_v15 = vsel %vm446_vm0, %v1467_v14, 0.0 }
 0x43f   : > { %826 = vadd.xlane.f32.xlu1 %v825_v15 }
 0x4b2   : > { %v827_v25 = vpop.xlane.xlu1 %826 }
 0x4b3   : > { %v835_v26 = vmul.f32 %v834_v24, %v827_v25 }
 0x4b5   : > { %v836_v27 = vsub.f32 %v1467_v14, %v835_v26 }
 0x4b7   : > { %v837_v28 = vmul.f32 %v836_v27, %v836_v27 }
 0x4b9   : > { %v838_v2 = vsel %vm446_vm0, %v837_v28, 0.0 }
 0x4ba   : > { %839 = vadd.xlane.f32.xlu0 %v838_v2 }
 0x52d   : > { %v840_v18 = vpop.xlane.xlu0 %839 }
 0x52e   : > { %v841_v31 = vmul.f32 %v840_v18, %v834_v24 }
 0x530   : > { %v842_v23 = vadd.f32 1e-05, %v841_v31 }
 0x532   : > { %1185 = vrsqrt.f32 %v842_v23  ;;  %vm849_vm6 = vweird.f32 %v842_v23 }
 0x538   : > { %v1186_v32 = vpop.eup %1185 }
 0x539   : > { %v844_v33 = vmul.f32 %v1186_v32, %v842_v23  ;;  %vm850_vm5 = vweird.f32 %v1186_v32 }
 0x53a   : > { %vm851_vm7 = vmor %vm849_vm6, %vm850_vm5 }
 0x53b   : > { %v845_v34 = vmul.f32 %v1186_v32, %v844_v33 }
 0x53d   : > { %v846_v35 = vmul.f32 0.5, %v845_v34 }
 0x53f   : > { %v847_v36 = vsub.f32 1.5, %v846_v35 }
 0x541   : > { %v848_v37 = vmul.f32 %v1186_v32, %v847_v36 }
 0x543   : > { %v852_v39 = vsel %vm851_vm7, %v1186_v32, %v848_v37 }
 0x544   : > { %v853_v40 = vmul.f32 %v852_v39, %v836_v27 }
 0x546   : > { %v858_v42 = vmul.f32 %v1163_v38, %v853_v40 }
 0x548   : > { %v863_v43 = vadd.f32 %v1164_v41, %v858_v42 }
 0x54a   : > { %v864_v44 = vpack.c.bf16 %v863_v43, %v863_v43 }
 0x54c   : > { %1085 = vmatmul.msk.bf16.vlgmr.msrb.gmra.mxu1 %vm446_vm0, %v864_v44 }
 0x5c9   : > { %v897_v50 = vpop.f32.mrf.mxu1 }
 0x5ca   : > { %v898_v51 = vadd.f32 %v1165_v49, %v897_v50 }
 0x5cc   : > { %v902_v52 = vmul.f32 %v898_v51, %v898_v51  ;;  %v901_v59 = vmul.f32 0.5, %v898_v51 }
 0x5ce   : > { %v903_v53 = vmul.f32 %v902_v52, %v898_v51 }
 0x5d0   : > { %v904_v54 = vmul.f32 0.044715, %v903_v53 }
 0x5d1   : > { %v899_v55 = vpop.f32.mrf.mxu1 }
 0x5d2   : > { %v905_v56 = vadd.f32 %v904_v54, %v898_v51 }
 0x5d4   : > { %v906_v57 = vmul.f32 0.7978846, %v905_v56 }
 0x5d6   : > { %1187 = vtanh.f32 %v906_v57 }
 0x5dc   : > { %v1188_v58 = vpop.eup %1187 }
 0x5dd   : > { %v908_v60 = vadd.f32 1.0, %v1188_v58 }
 0x5df   : > { %v909_v61 = vmul.f32 %v908_v60, %v901_v59 }
 0x5e1   : > { %v910_v62 = vpack.c.bf16 %v909_v61, %v909_v61 }
 0x5e3   : > { %1102 = vmatmul.msk.bf16.vlgmr.msrb.gmra.mxu2 %vm947_vm8, %v910_v62 }
 0x666   : > { %v960_v0 = vpop.f32.mrf.mxu2 }
 0x667   : > { %v961_v1 = vadd.f32 %v1166_v63, %v960_v0 }
 0x669   : > { %v964_v3 = vadd.f32 %v961_v1, %v1467_v14 }
 0x66b   : > { %965 = vst.msk [vmem:[%s415_s15] sm:$0xff] %vm446_vm0, %v964_v3 }
 0x66c   : > { %1216 = shalt.err (!%p1213_p3)
}
 0x66d   : > { %1115 = dma.vmem_to_hbm [thread:$0]  (%p1363_p5), %s980_s19, 128, %s982_s1, %s967_s25  }
 0x66e   : > { %v962_v4 = vpop.f32.mrf.mxu2 }
 0x66f PF: > { %p1121_p4 = scmp.ge.s32.totalorder %s1251_s24, 2  ;;  %s993_s0 = sand.u32 1, %s1239_s21  }
 0x670   : > { %s994_s29 = scalar_lea.sflag [#allocation3], %s993_s0 }
 0x671   : > { %p1118_p7 = pnand %p1121_p4, %p1367_p6 }
 0x673   : > { %p1119_p8 = pneg %p1118_p7 }
 0x675   : > { %1234 = dma.done.wait (%p1119_p8), %s994_s29, 128  }
 0x676   : > { %1236 = vsyncadd (%p1119_p8), %s994_s29, 4294967168  ;;  %p22_p9 = scmp.ge.s32.totalorder %s1350_s27, 4   ;;  %s1559_s21 = smov %s1243_s22 }
 0x677   : > { %s1560_s22 = smov %s1247_s23  ;;  %s1561_s23 = smov %s1361_s30 }
 0x678   : > { %s1562_s24 = smov %s1350_s27  ;;  %24 = sbr.rel (!%p22_p9) target bundleno = 7 (0x7), region = 106 }
 0x67d   :  { %1000 = vsyncpa [#allocation3], 1 }
 0x67e   :  { %1002 = vsyncpa [#allocation3 + $0x1], 1 }

// kernel: encoder_forward.2
= control target key start
LH: loop header
LB: loop body
LE: loop exit
PB: predicated region body
PF: predicated region fallthrough
CT: control target
= control target key end

     0   :  { %s1215_s21 = smov 0   ;;  %s1364_s0 = inlined_call_operand.vmem [shape: f32[2,8,32], index: 0, kind: input, shape index: {}]   ;;  %s1365_s1 = inlined_call_operand.vmem [shape: f32[2,1,8], index: 1, kind: input, shape index: {}]   ;;  %s1366_s2 = inlined_call_operand.vmem [shape: bf16[32,96], index: 2, kind: input, shape index: {}]   ;;  %s1367_s3 = inlined_call_operand.vmem [shape: f32[1,96], index: 3, kind: input, shape index: {}]   ;;  %s1368_s4 = inlined_call_operand.vmem [shape: bf16[4,8,32], index: 4, kind: input, shape index: {}]   ;;  %s1369_s5 = inlined_call_operand.vmem [shape: f32[1,32], index: 5, kind: input, shape index: {}]   ;;  %s1370_s6 = inlined_call_operand.vmem [shape: f32[1,32], index: 6, kind: input, shape index: {}]   ;;  %s1371_s7 = inlined_call_operand.vmem [shape: f32[1,32], index: 7, kind: input, shape index: {}]   ;;  %s1372_s8 = inlined_call_operand.vmem [shape: bf16[32,64], index: 8, kind: input, shape index: {}]   ;;  %s1373_s9 = inlined_call_operand.vmem [shape: f32[1,64], index: 9, kind: input, shape index: {}]   ;;  %s1374_s10 = inlined_call_operand.vmem [shape: bf16[64,32], index: 10, kind: input, shape index: {}]   ;;  %s1375_s11 = inlined_call_operand.vmem [shape: f32[1,32], index: 11, kind: input, shape index: {}]   ;;  %s1376_s12 = inlined_call_operand.vmem [shape: f32[2,8,32], index: 12, kind: output, shape index: {}]  }
   0x1 LB: > { %s1028_s22 = sadd.s32 4294967295, %s1141_s21   ;;  %p1032_p0 = scmp.ge.s32.totalorder %s1141_s21, 1  ;;  %s1141_s21 = sphi %s1215_s21, %s22_s21  }
   0x2   : > { %p369_p1 = scmp.lt.s32.totalorder %s1141_s21, 3 }
   0x4   : > { %p370_p2 = pnand %p1032_p0, %p369_p1 }
   0x5   : > { %p412_p3 = scmp.lt.s32.totalorder (!%p370_p2), %s1028_s22, 1  ;;  %s1143_s15 = smov (!%p370_p2), 104  }
   0x6   : > { %373 = sbr.rel (%p370_p2) target bundleno = 1635 (0x663), region = 68  ;;  %s1144_s16 = smov (!%p370_p2), 120  }
   0x7   : > { %s1145_s17 = smov (!%p370_p2), 112   ;;  %s1146_s18 = smov (!%p370_p2), 96  }
   0x8   : > { %s1148_s24 = smov (!%p370_p2), 64  }
   0xb   : > { %v1085_v0 = vld [vmem:[%s1366_s2 + $0x8] sm:$0xff]  ;;  %v1084_v1 = vld [vmem:[%s1366_s2] sm:$0xff]  ;;  %s1378_s22 = smov (!%p412_p3, %s1028_s22), 1  ;;  %vm446_vm0 = vcmask 261120   ;;  %vm503_vm1 = vcmask 64512   ;;  %v1147_v40 = vmov 0.0  }
   0xc   : > { %456 = vmatpush.bf16.msra.mxu0 %v1085_v0  ;;  %s1033_s27 = sshll.u32 %s1378_s22, 3  ;;  %v1107_v4 = vld [vmem:[%s1367_s3] ss:$0 sm:$0xff]  ;;  %s418_s23 = scalar_lea.vmem %s1365_s1, %s1378_s22  ;;  %vm648_vm3 = vcmask 1043456   ;;  %vm947_vm8 = vcmask 523264  }
   0xd   : > { %s415_s30 = scalar_lea.vmem %s1364_s0, %s1033_s27  ;;  %v492_v39 = vld [vmem:[%s418_s23] sm:$0x1]  ;;  %s422_s28 = scalar_lea.vmem %s1376_s12, %s1033_s27 }
   0xe   : > { %v1237_v2 = vld [vmem:[%s415_s30] sm:$0xff]  ;;  %vm493_vm2 = vcmp.eq.f32.partialorder %v492_v39, 0.0 }
   0xf   : > { %v425_v3 = vpack.c.bf16 %v1237_v2, %v1237_v2  ;;  %v494_v41 = vsel %vm493_vm2, -1e+09, %v1147_v40  ;;  %v732_v40 = vld [vmem:[%s1368_s4] sm:$0xf] }
  0x10   : > { %457 = vmatpush.bf16.msra.mxu0 %v1084_v1  ;;  %v496_v42 = vperm.slane %v494_v41, 0  ;;  %v740_v41 = vsel %vm648_vm3, %v732_v40, 0 }
  0x13   : > { %1043 = vmatmul.msk.bf16.vlgmr.msra.gmra.mxu0 %vm446_vm0, %v425_v3 }
  0x90   : > { %v459_v5 = vpop.f32.mrf.mxu0 }
  0x91   : > { %v460_v6 = vadd.f32 %v1107_v4, %v459_v5 }
  0x93   : > { %485 = vrot.lane.b32.xlu1 %v460_v6, %s1143_s15  ;;  %479 = vrot.lane.b32.xlu0 %v460_v6, %s1144_s16  ;;  %v463_v8 = vmul.f32 0.35355338, %v460_v6  ;;  %v488_v13 = vpack.c.bf16 %v460_v6, %v460_v6 }
  0x95   : > { %v499_v16 = vunpack.c.l.b16 %v488_v13  ;;  %v474_v38 = vpack.c.bf16 %v463_v8, %v463_v8 }
  0x97   : > { %v500_v19 = vpack.c.b16 %v499_v16, %v499_v16 }
  0x98   : > { %v461_v7 = vpop.f32.mrf.mxu0 }
  0x9b   : > { %482 = vrot.lane.b32.xlu0 %v460_v6, %s1145_s17 }
  0xa3   : > { %468 = vrot.lane.b32.xlu0 %v463_v8, %s1145_s17 }
  0xab   : > { %471 = vrot.lane.b32.xlu0 %v463_v8, %s1143_s15 }
 0x105   : > { %v480_v9 = vpop.permute.xlu0 %479  ;;  %v486_v20 = vpop.permute.xlu1 %485 }
 0x106   : > { %v489_v10 = vpack.c.bf16 %v480_v9, %v480_v9  ;;  %v491_v21 = vpack.c.bf16 %v486_v20, %v486_v20 }
 0x108   : > { %v524_v11 = vunpack.c.l.b16 %v489_v10  ;;  %v572_v22 = vunpack.c.l.b16 %v491_v21 }
 0x10a   : > { %v1245_v12 = vpack.c.b16 %v524_v11, %v524_v11  ;;  %v1251_v23 = vpack.c.b16 %v572_v22, %v572_v22 }
 0x10c   : > { %526 = vrot.lane.b32.xlu1 %v1245_v12, %s1146_s18 }
 0x10d   : > { %v483_v14 = vpop.permute.xlu0 %482 }
 0x10e   : > { %v490_v15 = vpack.c.bf16 %v483_v14, %v483_v14 }
 0x110   : > { %v548_v17 = vunpack.c.l.b16 %v490_v15 }
 0x112   : > { %v1248_v18 = vpack.c.b16 %v548_v17, %v548_v17 }
 0x114   : > { %550 = vrot.lane.b32.xlu2 %v1248_v18, %s1146_s18  ;;  %501 = vrot.lane.b32.xlu1 %v500_v19, %s1146_s18 }
 0x115   : > { %v469_v26 = vpop.permute.xlu0 %468 }
 0x116   : > { %v476_v27 = vpack.c.bf16 %v469_v26, %v469_v26 }
 0x11c   : > { %465 = vrot.lane.b32.xlu2 %v463_v8, %s1144_s16 }
 0x11d   : > { %v472_v33 = vpop.permute.xlu0 %471 }
 0x11e   : > { %v477_v34 = vpack.c.bf16 %v472_v33, %v472_v33 }
 0x124   : > { %574 = vrot.lane.b32.xlu2 %v1251_v23, %s1146_s18 }
 0x16e   : > { %v551_v24 = vpop.permute.xlu2 %550 }
 0x16f   : > { %v556_v25 = vsel %vm503_vm1, %v551_v24, 0 }
 0x170   : > { %565 = vmatpush.bf16.xpose.msra.mxu3 %v556_v25 }
 0x176   : > { %v466_v28 = vpop.permute.xlu2 %465 }
 0x177   : > { %1046 = vmatmul.msk.bf16.vlgmr.msra.gmra.mxu3 %vm503_vm1, %v476_v27  ;;  %v475_v35 = vpack.c.bf16 %v466_v28, %v466_v28 }
 0x17e   : > { %v527_v29 = vpop.permute.xlu1 %526  ;;  %v575_v30 = vpop.permute.xlu2 %574 }
 0x17f   : > { %v532_v31 = vsel %vm503_vm1, %v527_v29, 0  ;;  %v580_v32 = vsel %vm503_vm1, %v575_v30, 0 }
 0x180   : > { %541 = vmatpush.bf16.xpose.msra.mxu2 %v532_v31  ;;  %589 = vmatpush.bf16.xpose.msrb.mxu0 %v580_v32 }
 0x186   : > { %v502_v36 = vpop.permute.xlu1 %501 }
 0x187   : > { %1045 = vmatmul.msk.bf16.vlgmr.msra.gmra.mxu2 %vm503_vm1, %v475_v35  ;;  %1047 = vmatmul.msk.bf16.vlgmr.msrb.gmra.mxu0 %vm503_vm1, %v477_v34  ;;  %v508_v37 = vsel %vm503_vm1, %v502_v36, 0 }
 0x188   : > { %517 = vmatpush.bf16.xpose.msra.mxu1 %v508_v37 }
 0x18f   : > { %1044 = vmatmul.msk.bf16.vlgmr.msra.gmra.mxu1 %vm503_vm1, %v474_v38 }
 0x1fa   : > { %v567_v43 = vpop.f32.mrf.mxu3 }
 0x1fb   : > { %v568_v44 = vadd.f32 %v567_v43, %v496_v42 }
 0x1fd   : > { %v601_v45 = vsel %vm503_vm1, %v568_v44, -inf }
 0x1fe   : > { %602 = vmax.xlane.f32.xlu2 %v601_v45 }
 0x202   : > { %v569_v46 = vpop.f32.mrf.mxu3 }
 0x203   : > { %v734_v46 = vld [vmem:[%s1368_s4 + $0x8] sm:$0xf] }
 0x204   : > { %v591_v47 = vpop.f32.mrf.mxu0 }
 0x205   : > { %v592_v48 = vadd.f32 %v591_v47, %v496_v42  ;;  %v778_v47 = vsel %vm648_vm3, %v734_v46, 0  ;;  %v1090_v46 = vld [vmem:[%s1374_s10 + $0x10] sm:$0xff] }
 0x207   : > { %v604_v49 = vsel %vm503_vm1, %v592_v48, -inf }
 0x208   : > { %605 = vmax.xlane.f32.xlu2 %v604_v49 }
 0x20a   : > { %v543_v50 = vpop.f32.mrf.mxu2 }
 0x20b   : > { %v544_v51 = vadd.f32 %v543_v50, %v496_v42 }
 0x20c   : > { %v519_v52 = vpop.f32.mrf.mxu1  ;;  %v593_v53 = vpop.f32.mrf.mxu0 }
 0x20d   : > { %v520_v54 = vadd.f32 %v519_v52, %v496_v42  ;;  %v598_v55 = vsel %vm503_vm1, %v544_v51, -inf  ;;  %v733_v42 = vld [vmem:[%s1368_s4 + $0x4] sm:$0xf] }
 0x20e   : > { %599 = vmax.xlane.f32.xlu1 %v598_v55  ;;  %v759_v43 = vsel %vm648_vm3, %v733_v42, 0 }
 0x20f   : > { %v595_v56 = vsel %vm503_vm1, %v520_v54, -inf }
 0x210   : > { %596 = vmax.xlane.f32.xlu0 %v595_v56 }
 0x212   : > { %v545_v57 = vpop.f32.mrf.mxu2 }
 0x214   : > { %v521_v58 = vpop.f32.mrf.mxu1 }
 0x224   : > { %665 = vrot.lane.b32.xlu0 %v1245_v12, %s1148_s24 }
 0x22c   : > { %643 = vrot.lane.b32.xlu0 %v500_v19, %s1148_s24 }
 0x271   : > { %v603_v59 = vpop.xlane.xlu2 %602 }
 0x272   : > { %v609_v9 = vsub.f32 %v568_v44, %v603_v59  ;;  %v735_v44 = vld [vmem:[%s1368_s4 + $0xc] sm:$0xf] }
 0x273   : > { %v797_v45 = vsel %vm648_vm3, %v735_v44, 0 }
 0x274   : > { %v615_v11 = vmul.f32 1.442695, %v609_v9  ;;  %v1108_v9 = vld [vmem:[%s1369_s5] ss:$0 sm:$0xff] }
 0x27b   : > { %v606_v62 = vpop.xlane.xlu2 %605 }
 0x27c   : > { %v610_v3 = vsub.f32 %v592_v48, %v606_v62 }
 0x27e   : > { %v617_v5 = vmul.f32 1.442695, %v610_v3 }
 0x281   : > { %v600_v60 = vpop.xlane.xlu1 %599 }
 0x282   : > { %v608_v61 = vsub.f32 %v544_v51, %v600_v60 }
 0x283   : > { %v597_v63 = vpop.xlane.xlu0 %596 }
 0x284   : > { %v613_v0 = vmul.f32 1.442695, %v608_v61  ;;  %v607_v1 = vsub.f32 %v520_v54, %v597_v63 }
 0x286   : > { %1113 = vpow2.f32 %v613_v0  ;;  %v611_v4 = vmul.f32 1.442695, %v607_v1 }
 0x288   : > { %1115 = vpow2.f32 %v611_v4 }
 0x289   : > { %1117 = vpow2.f32 %v617_v5 }
 0x28a   : > { %1119 = vpow2.f32 %v615_v11 }
 0x28c   : > { %v1114_v6 = vpop.eup %1113 }
 0x28d   : > { %v622_v7 = vsel %vm503_vm1, %v1114_v6, 0.0 }
 0x28e   : > { %v1116_v8 = vpop.eup %1115  ;;  %623 = vadd.xlane.f32.xlu1 %v622_v7 }
 0x28f   : > { %v619_v10 = vsel %vm503_vm1, %v1116_v8, 0.0  ;;  %v1118_v12 = vpop.eup %1117 }
 0x290   : > { %620 = vadd.xlane.f32.xlu2 %v619_v10  ;;  %v628_v14 = vsel %vm503_vm1, %v1118_v12, 0.0  ;;  %v1120_v16 = vpop.eup %1119 }
 0x291   : > { %v625_v19 = vsel %vm503_vm1, %v1120_v16, 0.0 }
 0x296   : > { %v666_v13 = vpop.permute.xlu0 %665 }
 0x297   : > { %v671_v15 = vsel %vm648_vm3, %v666_v13, 0 }
 0x298   : > { %629 = vadd.xlane.f32.xlu2 %v628_v14  ;;  %680 = vmatpush.bf16.msrb.mxu2 %v671_v15 }
 0x29c   : > { %768 = vmatpush.bf16.msra.mxu2 %v759_v43 }
 0x29e   : > { %v644_v17 = vpop.permute.xlu0 %643 }
 0x29f   : > { %v650_v20 = vsel %vm648_vm3, %v644_v17, 0 }
 0x2a0   : > { %626 = vadd.xlane.f32.xlu2 %v625_v19  ;;  %659 = vmatpush.bf16.msrb.mxu1 %v650_v20 }
 0x2a4   : > { %749 = vmatpush.bf16.msra.mxu1 %v740_v41  ;;  %v1110_v41 = vld [vmem:[%s1371_s7] ss:$0 sm:$0xff] }
 0x2a7   : > { %686 = vrot.lane.b32.xlu1 %v1248_v18, %s1148_s24 }
 0x2b8   : > { %707 = vrot.lane.b32.xlu2 %v1251_v23, %s1148_s24 }
 0x301   : > { %v624_v21 = vpop.xlane.xlu1 %623 }
 0x302   : > { %1121 = vrcp.f32 %v624_v21 }
 0x303   : > { %v621_v22 = vpop.xlane.xlu2 %620 }
 0x304   : > { %1123 = vrcp.f32 %v621_v22 }
 0x308   : > { %v1122_v24 = vpop.eup %1121 }
 0x309   : > { %v636_v25 = vmul.f32 %v1122_v24, %v1114_v6 }
 0x30a   : > { %v1124_v26 = vpop.eup %1123 }
 0x30b   : > { %v635_v27 = vmul.f32 %v1124_v26, %v1116_v8  ;;  %v630_v28 = vpop.xlane.xlu2 %629  ;;  %v640_v29 = vpack.c.bf16 %v636_v25, %v636_v25 }
 0x30c   : > { %1125 = vrcp.f32 %v630_v28 }
 0x30d   : > { %1049 = vmatmul.msk.bf16.vlgmr.msrb.gmra.mxu2 %vm503_vm1, %v640_v29  ;;  %v639_v30 = vpack.c.bf16 %v635_v27, %v635_v27  ;;  %v1087_v29 = vld [vmem:[%s1372_s8 + $0x8] sm:$0xff] }
 0x30f   : > { %1048 = vmatmul.msk.bf16.vlgmr.msrb.gmra.mxu1 %vm503_vm1, %v639_v30  ;;  %v1086_v30 = vld [vmem:[%s1372_s8] sm:$0xff] }
 0x310   : > { %894 = vmatpush.bf16.msrb.mxu1 %v1087_v29 }
 0x312   : > { %v1126_v31 = vpop.eup %1125 }
 0x313   : > { %v627_v18 = vpop.xlane.xlu2 %626  ;;  %v638_v33 = vmul.f32 %v1126_v31, %v1118_v12 }
 0x314   : > { %1127 = vrcp.f32 %v627_v18  ;;  %895 = vmatpush.bf16.msrb.mxu1 %v1086_v30 }
 0x315   : > { %v642_v39 = vpack.c.bf16 %v638_v33, %v638_v33 }
 0x319   : > { %v687_v23 = vpop.permute.xlu1 %686 }
 0x31a   : > { %v1128_v32 = vpop.eup %1127  ;;  %v692_v34 = vsel %vm648_vm3, %v687_v23, 0 }
 0x31b   : > { %v637_v35 = vmul.f32 %v1128_v32, %v1120_v16  ;;  %701 = vmatpush.bf16.msrb.mxu3 %v692_v34  ;;  %v708_v36 = vpop.permute.xlu2 %707  ;;  %v1149_v16 = vmov 32.0  }
 0x31c   : > { %v713_v37 = vsel %vm648_vm3, %v708_v36, 0  ;;  %1129 = vrcp.f32 %v1149_v16 }
 0x31d   : > { %722 = vmatpush.bf16.msra.mxu0 %v713_v37  ;;  %v641_v38 = vpack.c.bf16 %v637_v35, %v637_v35 }
 0x31f   : > { %1050 = vmatmul.msk.bf16.vlgmr.msrb.gmra.mxu3 %vm503_vm1, %v641_v38  ;;  %v1109_v38 = vld [vmem:[%s1370_s6] ss:$0 sm:$0xff] }
 0x320   : > { %1051 = vmatmul.msk.bf16.vlgmr.msra.gmra.mxu0 %vm503_vm1, %v642_v39  ;;  %787 = vmatpush.bf16.msra.mxu3 %v778_v47  ;;  %v1089_v47 = vld [vmem:[%s1374_s10 + $0x8] sm:$0xff] }
 0x321   : > { %806 = vmatpush.bf16.msrb.mxu0 %v797_v45  ;;  %v1091_v45 = vld [vmem:[%s1374_s10 + $0x18] sm:$0xff] }
 0x322   : > { %v1130_v17 = vpop.eup %1129  ;;  %955 = vmatpush.bf16.msrb.mxu2 %v1091_v45 }
 0x323   : > { %v829_v19 = vmul.f32 32.0, %v1130_v17  ;;  %vm833_vm4 = vweird.f32 %v1130_v17 }
 0x325   : > { %v830_v20 = vsub.f32 1.0, %v829_v19 }
 0x326   : > { %956 = vmatpush.bf16.msrb.mxu2 %v1090_v46 }
 0x327   : > { %v831_v21 = vmul.f32 %v1130_v17, %v830_v20 }
 0x329   : > { %v832_v22 = vadd.f32 %v1130_v17, %v831_v21 }
 0x32a   : > { %957 = vmatpush.bf16.msrb.mxu2 %v1089_v47 }
 0x32b   : > { %v834_v24 = vsel %vm833_vm4, %v1130_v17, %v832_v22 }
 0x38c   : > { %v661_v48 = vpop.f32.mrf.mxu1 }
 0x38d   : > { %v728_v49 = vpack.c.bf16 %v661_v48, %v661_v48  ;;  %v1088_v48 = vld [vmem:[%s1374_s10] sm:$0xff] }
 0x38e   : > { %958 = vmatpush.bf16.msrb.mxu2 %v1088_v48 }
 0x38f   : > { %1052 = vmatmul.msk.bf16.vlgmr.msra.gmra.mxu1 %vm503_vm1, %v728_v49  ;;  %v1111_v49 = vld [vmem:[%s1373_s9] ss:$0 sm:$0xff] }
 0x390   : > { %v682_v50 = vpop.f32.mrf.mxu2 }
 0x391   : > { %v729_v51 = vpack.c.bf16 %v682_v50, %v682_v50 }
 0x393   : > { %1053 = vmatmul.msk.bf16.vlgmr.msra.gmra.mxu2 %vm503_vm1, %v729_v51 }
 0x394   : > { %v663_v52 = vpop.f32.mrf.mxu1 }
 0x398   : > { %v684_v53 = vpop.f32.mrf.mxu2 }
 0x39d   : > { %v724_v54 = vpop.f32.mrf.mxu0 }
 0x39e   : > { %v731_v55 = vpack.c.bf16 %v724_v54, %v724_v54 }
 0x3a0   : > { %1055 = vmatmul.msk.bf16.vlgmr.msrb.gmra.mxu0 %vm503_vm1, %v731_v55 }
 0x3a2   : > { %v703_v56 = vpop.f32.mrf.mxu3 }
 0x3a3   : > { %v730_v57 = vpack.c.bf16 %v703_v56, %v703_v56 }
 0x3a5   : > { %v726_v58 = vpop.f32.mrf.mxu0  ;;  %1054 = vmatmul.msk.bf16.vlgmr.msra.gmra.mxu3 %vm503_vm1, %v730_v57 }
 0x3aa   : > { %v705_v59 = vpop.f32.mrf.mxu3 }
 0x40c   : > { %v751_v60 = vpop.f32.mrf.mxu1 }
 0x40d   : > { %v812_v4 = vsel %vm446_vm0, %v751_v60, 0.0 }
 0x414   : > { %v753_v61 = vpop.f32.mrf.mxu1 }
 0x416   : > { %v770_v62 = vpop.f32.mrf.mxu2 }
 0x417   : > { %v813_v1 = vsel %vm446_vm0, %v770_v62, 0.0 }
 0x418   : > { %v814_v5 = vadd.f32 %v813_v1, %v812_v4 }
 0x41d   : > { %v808_v63 = vpop.f32.mrf.mxu0 }
 0x41e   : > { %v772_v0 = vpop.f32.mrf.mxu2  ;;  %v817_v10 = vsel %vm446_vm0, %v808_v63, 0.0  ;;  %v1112_v63 = vld [vmem:[%s1375_s11] ss:$0 sm:$0xff] }
 0x425   : > { %v810_v3 = vpop.f32.mrf.mxu0 }
 0x428   : > { %v789_v6 = vpop.f32.mrf.mxu3 }
 0x429   : > { %v815_v7 = vsel %vm446_vm0, %v789_v6, 0.0 }
 0x42a   : > { %v816_v8 = vadd.f32 %v815_v7, %v814_v5 }
 0x42c   : > { %v818_v11 = vadd.f32 %v817_v10, %v816_v8 }
 0x42e   : > { %v823_v12 = vadd.f32 %v1108_v9, %v818_v11 }
 0x430   : > { %v791_v13 = vpop.f32.mrf.mxu3  ;;  %v1317_v14 = vadd.f32 %v823_v12, %v1237_v2 }
 0x432   : > { %v825_v15 = vsel %vm446_vm0, %v1317_v14, 0.0 }
 0x433   : > { %826 = vadd.xlane.f32.xlu1 %v825_v15 }
 0x4a6   : > { %v827_v25 = vpop.xlane.xlu1 %826 }
 0x4a7   : > { %v835_v26 = vmul.f32 %v834_v24, %v827_v25 }
 0x4a9   : > { %v836_v27 = vsub.f32 %v1317_v14, %v835_v26 }
 0x4ab   : > { %v837_v28 = vmul.f32 %v836_v27, %v836_v27 }
 0x4ad   : > { %v838_v2 = vsel %vm446_vm0, %v837_v28, 0.0 }
 0x4ae   : > { %839 = vadd.xlane.f32.xlu0 %v838_v2 }
 0x521   : > { %v840_v18 = vpop.xlane.xlu0 %839 }
 0x522   : > { %v841_v31 = vmul.f32 %v840_v18, %v834_v24 }
 0x524   : > { %v842_v23 = vadd.f32 1e-05, %v841_v31 }
 0x526   : > { %1131 = vrsqrt.f32 %v842_v23  ;;  %vm849_vm6 = vweird.f32 %v842_v23 }
 0x52c   : > { %v1132_v32 = vpop.eup %1131 }
 0x52d   : > { %v844_v33 = vmul.f32 %v1132_v32, %v842_v23  ;;  %vm850_vm5 = vweird.f32 %v1132_v32 }
 0x52e   : > { %vm851_vm7 = vmor %vm849_vm6, %vm850_vm5 }
 0x52f   : > { %v845_v34 = vmul.f32 %v1132_v32, %v844_v33 }
 0x531   : > { %v846_v35 = vmul.f32 0.5, %v845_v34 }
 0x533   : > { %v847_v36 = vsub.f32 1.5, %v846_v35 }
 0x535   : > { %v848_v37 = vmul.f32 %v1132_v32, %v847_v36 }
 0x537   : > { %v852_v39 = vsel %vm851_vm7, %v1132_v32, %v848_v37 }
 0x538   : > { %v853_v40 = vmul.f32 %v852_v39, %v836_v27 }
 0x53a   : > { %v858_v42 = vmul.f32 %v1109_v38, %v853_v40 }
 0x53c   : > { %v863_v43 = vadd.f32 %v1110_v41, %v858_v42 }
 0x53e   : > { %v864_v44 = vpack.c.bf16 %v863_v43, %v863_v43 }
 0x540   : > { %1064 = vmatmul.msk.bf16.vlgmr.msrb.gmra.mxu1 %vm446_vm0, %v864_v44 }
 0x5bd   : > { %v897_v50 = vpop.f32.mrf.mxu1 }
 0x5be   : > { %v898_v51 = vadd.f32 %v1111_v49, %v897_v50 }
 0x5c0   : > { %v902_v52 = vmul.f32 %v898_v51, %v898_v51  ;;  %v901_v59 = vmul.f32 0.5, %v898_v51 }
 0x5c2   : > { %v903_v53 = vmul.f32 %v902_v52, %v898_v51 }
 0x5c4   : > { %v904_v54 = vmul.f32 0.044715, %v903_v53 }
 0x5c5   : > { %v899_v55 = vpop.f32.mrf.mxu1 }
 0x5c6   : > { %v905_v56 = vadd.f32 %v904_v54, %v898_v51 }
 0x5c8   : > { %v906_v57 = vmul.f32 0.7978846, %v905_v56 }
 0x5ca   : > { %1133 = vtanh.f32 %v906_v57 }
 0x5d0   : > { %v1134_v58 = vpop.eup %1133 }
 0x5d1   : > { %v908_v60 = vadd.f32 1.0, %v1134_v58 }
 0x5d3   : > { %v909_v61 = vmul.f32 %v908_v60, %v901_v59 }
 0x5d5   : > { %v910_v62 = vpack.c.bf16 %v909_v61, %v909_v61 }
 0x5d7   : > { %1081 = vmatmul.msk.bf16.vlgmr.msrb.gmra.mxu2 %vm947_vm8, %v910_v62 }
 0x65a   : > { %v960_v0 = vpop.f32.mrf.mxu2 }
 0x65b   : > { %v961_v1 = vadd.f32 %v1112_v63, %v960_v0 }
 0x65d   : > { %v964_v3 = vadd.f32 %v961_v1, %v1317_v14 }
 0x65f   : > { %965 = vst.msk [vmem:[%s422_s28] sm:$0xff] %vm446_vm0, %v964_v3 }
 0x662   : > { %v962_v4 = vpop.f32.mrf.mxu2 }
 0x663 PF: > { %s22_s21 = sadd.s32 1, %s1141_s21  }
 0x664   : > { %p19_p4 = scmp.ge.s32.totalorder %s22_s21, 4  }
 0x666   :  { %21 = sbr.rel (!%p19_p4) target bundleno = 1 (0x1), region = 101 }

</bundles_post_ra>
